<compile_context>
chip_gen: v7x
topology: tpu7x:2x2x1
jax: 0.10.0
libtpu: 0.0.40
codegen_flags: <defaults>
</compile_context>

<pallas_src>
import functools

import jax
import jax.numpy as jnp
from jax.experimental import pallas as pl
from jax.experimental.pallas import tpu as pltpu


def _nonlocal_kernel(x_ref, wall_ref, ball_ref, wo_ref, bo_ref, out_ref,
                     theta_scr, *, hw4, ct, q_tile, num_q_tiles, unroll):
    """One batch element of the non-local block.

    x_ref : (1, HW, C) window-element-major rows: row = e*HW/4 + q, with
            e = 2*(h%2)+(w%2) enumerating the 2x2 pooling window and
            q = (h//2)*(W//2)+(w//2) the pooled spatial index.  The same rows
            feed the fused projection and the residual.
    wall_ref : (C, 2*Ct+Cg) fused [theta | phi | g] 1x1-conv weight.
    wo_ref   : (Cg, C) out_conv weight with gamma pre-folded.
    """
    f32 = jnp.float32
    x = x_ref[0]                                           # (HW, C)

    # Fused theta|phi|g 1x1 conv: single MXU pass over the activations.
    full = jnp.dot(x, wall_ref[...], preferred_element_type=f32) + ball_ref[...]
    # theta columns -> VMEM scratch so the q-tile loop can take dynamic-start
    # sublane slices through a Ref.
    theta_scr[...] = full[:, :ct]

    # 2x2 max-pool == max over the four aligned HW/4-row window slices
    # (hw4 is asserted to be a multiple of 8, so slices are sublane-aligned).
    pooled = jnp.maximum(
        jnp.maximum(full[0 * hw4:1 * hw4], full[1 * hw4:2 * hw4]),
        jnp.maximum(full[2 * hw4:3 * hw4], full[3 * hw4:4 * hw4]))
    phi_pool = pooled[:, ct:2 * ct]                        # (HW/4, Ct)
    g_pool = pooled[:, 2 * ct:]                            # (HW/4, Cg)

    wo = wo_ref[...]                                       # gamma pre-folded
    bo = bo_ref[...]

    def q_body(t, carry):
        start = pl.multiple_of(t * q_tile, q_tile)
        theta_t = theta_scr[pl.ds(start, q_tile), :]       # (TQ, Ct)

        # energy = theta @ phi^T -> (TQ, HW/4); softmax over last axis with
        # the normalization deferred past the PV matmul.
        energy = jax.lax.dot_general(theta_t, phi_pool,
                                     (((1,), (1,)), ((), ())),
                                     preferred_element_type=f32)
        energy = jnp.exp(energy - jnp.max(energy, axis=-1, keepdims=True))
        denom = jnp.sum(energy, axis=-1, keepdims=True)    # (TQ, 1)

        out_feat = jnp.dot(energy, g_pool, preferred_element_type=f32)  # (TQ, Cg)
        # Exact reciprocal keeps the 1e-4 tolerance; approx=True would push
        # the divide onto the EUP if looser tolerance is acceptable.
        out_feat = out_feat * pl.reciprocal(denom, approx=False)

        # out_conv (gamma folded) + residual.
        out2 = jnp.dot(out_feat, wo, preferred_element_type=f32) + bo
        out_ref[0, pl.ds(start, q_tile), :] = out2 + x_ref[0, pl.ds(start, q_tile), :]
        return carry

    jax.lax.fori_loop(0, num_q_tiles, q_body, 0, unroll=unroll)


def non_local_2d_block(x, params, gamma, *, q_tile=128):
    """x: (N, C, H, W) float32 (NCHW, as in the PyTorch module)."""
    n, c, h, w = x.shape
    assert h % 2 == 0 and w % 2 == 0, "2x2 max-pool requires even H, W"
    assert c % 8 == 0, "in_channels must be divisible by 8"
    hw = h * w
    hw4 = hw // 4
    assert hw4 % 8 == 0, "HW/4 must be a multiple of 8 (sublane alignment)"
    ct = c // 8
    cg = c // 2

    q_tile = min(q_tile, hw)
    assert q_tile % 8 == 0 and hw % q_tile == 0, "q_tile must tile HW, sublane-aligned"
    num_q_tiles = hw // q_tile
    unroll = num_q_tiles <= 8          # static decision; full unroll when short

    wt, bt, wp, bp, wg, bg, wo, bo = params
    # Fuse the three input projections into one matmul (shared LHS pass).
    wall = jnp.concatenate([wt, wp, wg], axis=1)            # (C, 2*Ct+Cg)
    ball = jnp.concatenate([bt, bp, bg], axis=1)            # (1, 2*Ct+Cg)
    # Fold gamma into the output conv: gamma*(y@Wo+bo)+x == y@(gamma*Wo)+gamma*bo+x.
    gamma = jnp.float32(gamma)
    wo_g = gamma * wo
    bo_g = gamma * bo

    # Glue: NCHW -> single window-element-major (N, HW, C) copy.
    x_win = (x.reshape(n, c, h // 2, 2, w // 2, 2)
              .transpose(0, 3, 5, 2, 4, 1)                  # (n, a, b, i, j, c)
              .reshape(n, hw, c))

    # VMEM budget: tile-padded blocks + weights + scratch + in-kernel temporaries.
    def pad(r, co):
        return ((r + 7) // 8) * 8 * ((co + 127) // 128) * 128
    wall_w = 2 * ct + cg
    fp = 4
    vmem_req = fp * (2 * 2 * pad(hw, c)                                   # x + out, 2x buffered
                     + 2 * (pad(c, wall_w) + pad(1, wall_w) + pad(cg, c) + pad(1, c))
                     + pad(hw, ct)                                        # theta scratch
                     + pad(hw, wall_w) + pad(hw4, wall_w)                 # full + pooled
                     + 3 * pad(q_tile, hw4)                               # energy/exp temps
                     + 2 * pad(q_tile, c) + pad(q_tile, cg) + pad(q_tile, ct))
    vmem_limit = int(min(max(vmem_req + (4 << 20), 32 << 20), 64 << 20))  # <= v7x physical

    def full_spec(shape):
        return pl.BlockSpec(shape, lambda b, _nd=len(shape): (0,) * _nd)

    kernel = functools.partial(_nonlocal_kernel, hw4=hw4, ct=ct,
                               q_tile=q_tile, num_q_tiles=num_q_tiles, unroll=unroll)

    out = pl.pallas_call(
        kernel,
        out_shape=jax.ShapeDtypeStruct((n, hw, c), jnp.float32),
        grid=(n,),
        in_specs=[
            pl.BlockSpec((1, hw, c), lambda b: (b, 0, 0)),   # activations (single copy)
            full_spec((c, wall_w)), full_spec((1, wall_w)),  # fused theta|phi|g conv
            full_spec((cg, c)), full_spec((1, c)),           # out conv (gamma folded)
        ],
        out_specs=pl.BlockSpec((1, hw, c), lambda b: (b, 0, 0)),
        scratch_shapes=[pltpu.VMEM((hw, ct), jnp.float32)],
        compiler_params=pltpu.CompilerParams(
            dimension_semantics=("parallel",),
            vmem_limit_bytes=vmem_limit),
    )(x_win, wall, ball, wo_g, bo_g)

    # Glue: window-element-major (N, HW, C) -> NCHW.
    out = (out.reshape(n, 2, 2, h // 2, w // 2, c)
              .transpose(0, 5, 3, 1, 4, 2)                  # (n, c, i, a, j, b)
              .reshape(n, c, h, w))
    return out


def reference(x, params, gamma):
    """Pure-JAX mirror of the PyTorch forward for verification."""
    wt, bt, wp, bp, wg, bg, wo, bo = params
    n, c, h, w = x.shape
    hw = h * w

    def conv1x1(inp, wmat, b):
        return jnp.einsum('nchw,cd->ndhw', inp, wmat) + b.reshape(1, -1, 1, 1)

    def maxpool2(inp):
        n_, c_, h_, w_ = inp.shape
        return jnp.max(inp.reshape(n_, c_, h_ // 2, 2, w_ // 2, 2), axis=(3, 5))

    theta = conv1x1(x, wt, bt).reshape(n, -1, hw).transpose(0, 2, 1)
    phi = maxpool2(conv1x1(x, wp, bp)).reshape(n, -1, hw // 4)
    energy = jnp.einsum('npc,ncq->npq', theta, phi)
    attention = jax.nn.softmax(energy, axis=-1)
    g = maxpool2(conv1x1(x, wg, bg)).reshape(n, -1, hw // 4)
    out = jnp.einsum('ncq,npq->ncp', g, attention).reshape(n, c // 2, h, w)
    out = conv1x1(out, wo, bo)
    return gamma * out + x


if __name__ == "__main__":
    key = jax.random.PRNGKey(0)
    N, C, H, W = 2, 16, 16, 16          # in_channels must be divisible by 8
    ct, cg = C // 8, C // 2

    keys = jax.random.split(key, 9)
    x = jax.random.normal(keys[0], (N, C, H, W), jnp.float32)
    scale = 0.1
    wt = scale * jax.random.normal(keys[1], (C, ct), jnp.float32)
    bt = scale * jax.random.normal(keys[2], (1, ct), jnp.float32)
    wp = scale * jax.random.normal(keys[3], (C, ct), jnp.float32)
    bp = scale * jax.random.normal(keys[4], (1, ct), jnp.float32)
    wg = scale * jax.random.normal(keys[5], (C, cg), jnp.float32)
    bg = scale * jax.random.normal(keys[6], (1, cg), jnp.float32)
    wo = scale * jax.random.normal(keys[7], (cg, C), jnp.float32)
    bo = scale * jax.random.normal(keys[8], (1, C), jnp.float32)
    params = (wt, bt, wp, bp, wg, bg, wo, bo)

    # nn.Parameter(torch.zeros(1)) initializes gamma to 0 (output == input);
    # use a deterministic nonzero value so the attention path is exercised.
    gamma = 0.5

    out = non_local_2d_block(x, params, gamma)   # HW=256, q_tile=128 -> 2 query tiles
    out = jax.block_until_ready(out)

    ref = reference(x, params, gamma)
    assert out.shape == x.shape and out.dtype == jnp.float32
    assert jnp.allclose(out, ref, atol=1e-4, rtol=1e-4), float(jnp.max(jnp.abs(out - ref)))
    print("KERNEL_OK")
</pallas_src>

<mosaic_0001>
module attributes {stable_mosaic.version = 11 : i64} {
  func.func @_nonlocal_kernel(%arg0: i32, %arg1: memref<1x256x16xf32, #tpu.memory_space<vmem>>, %arg2: memref<16x12xf32, #tpu.memory_space<vmem>>, %arg3: memref<1x12xf32, #tpu.memory_space<vmem>>, %arg4: memref<8x16xf32, #tpu.memory_space<vmem>>, %arg5: memref<1x16xf32, #tpu.memory_space<vmem>>, %arg6: memref<1x256x16xf32, #tpu.memory_space<vmem>>, %arg7: memref<256x2xf32, #tpu.memory_space<vmem>>) attributes {dimension_semantics = [#tpu.dimension_semantics<parallel>], iteration_bounds = array<i64: 2>, scalar_prefetch = 0 : i64, scratch_operands = 1 : i64, tpu.core_type = #tpu.core_type<tc>, window_params = [{transform_indices = @transform_0, window_bounds = array<i64: 1, 256, 16>}, {pipeline_mode = #tpu.pipeline_mode<synchronous>, transform_indices = @transform_1, window_bounds = array<i64: 16, 12>}, {pipeline_mode = #tpu.pipeline_mode<synchronous>, transform_indices = @transform_2, window_bounds = array<i64: 1, 12>}, {pipeline_mode = #tpu.pipeline_mode<synchronous>, transform_indices = @transform_3, window_bounds = array<i64: 8, 16>}, {pipeline_mode = #tpu.pipeline_mode<synchronous>, transform_indices = @transform_4, window_bounds = array<i64: 1, 16>}, {transform_indices = @transform_5, window_bounds = array<i64: 1, 256, 16>}]} {
    %c0 = arith.constant 0 : index
    %c0_0 = arith.constant 0 : index
    %c0_1 = arith.constant 0 : index
    %0 = vector.load %arg1[%c0, %c0_0, %c0_1] : memref<1x256x16xf32, #tpu.memory_space<vmem>>, vector<1x256x16xf32>
    %1 = vector.shape_cast %0 : vector<1x256x16xf32> to vector<256x16xf32>
    %c0_2 = arith.constant 0 : index
    %c0_3 = arith.constant 0 : index
    %2 = vector.load %arg2[%c0_2, %c0_3] : memref<16x12xf32, #tpu.memory_space<vmem>>, vector<16x12xf32>
    %cst = arith.constant dense<0.000000e+00> : vector<256x12xf32>
    %3 = tpu.matmul %1, %2, %cst {dimension_numbers = #tpu.dot_dimension_numbers<[1], [0], [0], [1], [0, 0, 1, 1], [], []>} : vector<256x16xf32>, vector<16x12xf32>, vector<256x12xf32> -> vector<256x12xf32>
    %c0_4 = arith.constant 0 : index
    %c0_5 = arith.constant 0 : index
    %4 = vector.load %arg3[%c0_4, %c0_5] : memref<1x12xf32, #tpu.memory_space<vmem>>, vector<1x12xf32>
    %5 = vector.broadcast %4 : vector<1x12xf32> to vector<256x12xf32>
    %6 = arith.addf %3, %5 : vector<256x12xf32>
    %7 = vector.extract_strided_slice %6 {offsets = [0, 0], sizes = [256, 2], strides = [1, 1]} : vector<256x12xf32> to vector<256x2xf32>
    %c0_6 = arith.constant 0 : index
    %c0_7 = arith.constant 0 : index
    %8 = vector.load %arg7[%c0_6, %c0_7] : memref<256x2xf32, #tpu.memory_space<vmem>>, vector<256x2xf32>
    tpu.vector_store %arg7[%c0_6, %c0_7], %7 {strides = array<i32>} : memref<256x2xf32, #tpu.memory_space<vmem>>, vector<256x2xf32>,
    %9 = vector.extract_strided_slice %6 {offsets = [0, 0], sizes = [64, 12], strides = [1, 1]} : vector<256x12xf32> to vector<64x12xf32>
    %10 = vector.extract_strided_slice %6 {offsets = [64, 0], sizes = [64, 12], strides = [1, 1]} : vector<256x12xf32> to vector<64x12xf32>
    %11 = arith.maximumf %9, %10 : vector<64x12xf32>
    %12 = vector.extract_strided_slice %6 {offsets = [128, 0], sizes = [64, 12], strides = [1, 1]} : vector<256x12xf32> to vector<64x12xf32>
    %13 = vector.extract_strided_slice %6 {offsets = [192, 0], sizes = [64, 12], strides = [1, 1]} : vector<256x12xf32> to vector<64x12xf32>
    %14 = arith.maximumf %12, %13 : vector<64x12xf32>
    %15 = arith.maximumf %11, %14 : vector<64x12xf32>
    %16 = vector.extract_strided_slice %15 {offsets = [0, 2], sizes = [64, 2], strides = [1, 1]} : vector<64x12xf32> to vector<64x2xf32>
    %17 = vector.extract_strided_slice %15 {offsets = [0, 4], sizes = [64, 8], strides = [1, 1]} : vector<64x12xf32> to vector<64x8xf32>
    %c0_8 = arith.constant 0 : index
    %c0_9 = arith.constant 0 : index
    %18 = vector.load %arg4[%c0_8, %c0_9] : memref<8x16xf32, #tpu.memory_space<vmem>>, vector<8x16xf32>
    %c0_10 = arith.constant 0 : index
    %c0_11 = arith.constant 0 : index
    %19 = vector.load %arg5[%c0_10, %c0_11] : memref<1x16xf32, #tpu.memory_space<vmem>>, vector<1x16xf32>
    %c0_i32 = arith.constant 0 : i32
    %c128_i32 = arith.constant 128 : i32
    %20 = arith.muli %c0_i32, %c128_i32 : i32
    %21 = tpu.assume_multiple %20, 128 : i32
    %22 = arith.index_cast %21 : i32 to index
    %c0_12 = arith.constant 0 : index
    %23 = vector.load %arg7[%22, %c0_12] : memref<256x2xf32, #tpu.memory_space<vmem>>, vector<128x2xf32>
    %cst_13 = arith.constant dense<0.000000e+00> : vector<128x64xf32>
    %24 = tpu.matmul %23, %16, %cst_13 {dimension_numbers = #tpu.dot_dimension_numbers<[1], [1], [0], [0], [0, 0, 1, 0], [], []>} : vector<128x2xf32>, vector<64x2xf32>, vector<128x64xf32> -> vector<128x64xf32>
    %cst_14 = arith.constant dense<0xFF800000> : vector<128xf32>
    %25 = vector.multi_reduction <maximumf>, %24, %cst_14 [1] : vector<128x64xf32> to vector<128xf32>
    %26 = vector.shape_cast %25 : vector<128xf32> to vector<128x1xf32>
    %27 = vector.broadcast %26 : vector<128x1xf32> to vector<128x64xf32>
    %28 = arith.subf %24, %27 : vector<128x64xf32>
    %29 = math.exp %28 : vector<128x64xf32>
    %cst_15 = arith.constant dense<0.000000e+00> : vector<128xf32>
    %30 = vector.multi_reduction <add>, %29, %cst_15 [1] : vector<128x64xf32> to vector<128xf32>
    %31 = vector.shape_cast %30 : vector<128xf32> to vector<128x1xf32>
    %cst_16 = arith.constant dense<0.000000e+00> : vector<128x8xf32>
    %32 = tpu.matmul %29, %17, %cst_16 {dimension_numbers = #tpu.dot_dimension_numbers<[1], [0], [0], [1], [0, 0, 1, 1], [], []>} : vector<128x64xf32>, vector<64x8xf32>, vector<128x8xf32> -> vector<128x8xf32>
    %33 = tpu.reciprocal %31 : vector<128x1xf32> -> vector<128x1xf32>
    %34 = vector.broadcast %33 : vector<128x1xf32> to vector<128x8xf32>
    %35 = arith.mulf %32, %34 : vector<128x8xf32>
    %cst_17 = arith.constant dense<0.000000e+00> : vector<128x16xf32>
    %36 = tpu.matmul %35, %18, %cst_17 {dimension_numbers = #tpu.dot_dimension_numbers<[1], [0], [0], [1], [0, 0, 1, 1], [], []>} : vector<128x8xf32>, vector<8x16xf32>, vector<128x16xf32> -> vector<128x16xf32>
    %37 = vector.broadcast %19 : vector<1x16xf32> to vector<128x16xf32>
    %38 = arith.addf %36, %37 : vector<128x16xf32>
    %c0_18 = arith.constant 0 : index
    %39 = arith.index_cast %21 : i32 to index
    %c0_19 = arith.constant 0 : index
    %40 = vector.load %arg1[%c0_18, %39, %c0_19] : memref<1x256x16xf32, #tpu.memory_space<vmem>>, vector<1x128x16xf32>
    %41 = vector.shape_cast %40 : vector<1x128x16xf32> to vector<128x16xf32>
    %42 = arith.addf %38, %41 : vector<128x16xf32>
    %c0_20 = arith.constant 0 : index
    %43 = arith.index_cast %21 : i32 to index
    %c0_21 = arith.constant 0 : index
    %44 = vector.load %arg6[%c0_20, %43, %c0_21] : memref<1x256x16xf32, #tpu.memory_space<vmem>>, vector<1x128x16xf32>
    %45 = vector.shape_cast %44 : vector<1x128x16xf32> to vector<128x16xf32>
    %46 = vector.shape_cast %42 : vector<128x16xf32> to vector<1x128x16xf32>
    tpu.vector_store %arg6[%c0_20, %43, %c0_21], %46 {strides = array<i32>} : memref<1x256x16xf32, #tpu.memory_space<vmem>>, vector<1x128x16xf32>,
    %c1_i32 = arith.constant 1 : i32
    %c128_i32_22 = arith.constant 128 : i32
    %47 = arith.muli %c1_i32, %c128_i32_22 : i32
    %48 = tpu.assume_multiple %47, 128 : i32
    %49 = arith.index_cast %48 : i32 to index
    %c0_23 = arith.constant 0 : index
    %50 = vector.load %arg7[%49, %c0_23] : memref<256x2xf32, #tpu.memory_space<vmem>>, vector<128x2xf32>
    %cst_24 = arith.constant dense<0.000000e+00> : vector<128x64xf32>
    %51 = tpu.matmul %50, %16, %cst_24 {dimension_numbers = #tpu.dot_dimension_numbers<[1], [1], [0], [0], [0, 0, 1, 0], [], []>} : vector<128x2xf32>, vector<64x2xf32>, vector<128x64xf32> -> vector<128x64xf32>
    %cst_25 = arith.constant dense<0xFF800000> : vector<128xf32>
    %52 = vector.multi_reduction <maximumf>, %51, %cst_25 [1] : vector<128x64xf32> to vector<128xf32>
    %53 = vector.shape_cast %52 : vector<128xf32> to vector<128x1xf32>
    %54 = vector.broadcast %53 : vector<128x1xf32> to vector<128x64xf32>
    %55 = arith.subf %51, %54 : vector<128x64xf32>
    %56 = math.exp %55 : vector<128x64xf32>
    %cst_26 = arith.constant dense<0.000000e+00> : vector<128xf32>
    %57 = vector.multi_reduction <add>, %56, %cst_26 [1] : vector<128x64xf32> to vector<128xf32>
    %58 = vector.shape_cast %57 : vector<128xf32> to vector<128x1xf32>
    %cst_27 = arith.constant dense<0.000000e+00> : vector<128x8xf32>
    %59 = tpu.matmul %56, %17, %cst_27 {dimension_numbers = #tpu.dot_dimension_numbers<[1], [0], [0], [1], [0, 0, 1, 1], [], []>} : vector<128x64xf32>, vector<64x8xf32>, vector<128x8xf32> -> vector<128x8xf32>
    %60 = tpu.reciprocal %58 : vector<128x1xf32> -> vector<128x1xf32>
    %61 = vector.broadcast %60 : vector<128x1xf32> to vector<128x8xf32>
    %62 = arith.mulf %59, %61 : vector<128x8xf32>
    %cst_28 = arith.constant dense<0.000000e+00> : vector<128x16xf32>
    %63 = tpu.matmul %62, %18, %cst_28 {dimension_numbers = #tpu.dot_dimension_numbers<[1], [0], [0], [1], [0, 0, 1, 1], [], []>} : vector<128x8xf32>, vector<8x16xf32>, vector<128x16xf32> -> vector<128x16xf32>
    %64 = vector.broadcast %19 : vector<1x16xf32> to vector<128x16xf32>
    %65 = arith.addf %63, %64 : vector<128x16xf32>
    %c0_29 = arith.constant 0 : index
    %66 = arith.index_cast %48 : i32 to index
    %c0_30 = arith.constant 0 : index
    %67 = vector.load %arg1[%c0_29, %66, %c0_30] : memref<1x256x16xf32, #tpu.memory_space<vmem>>, vector<1x128x16xf32>
    %68 = vector.shape_cast %67 : vector<1x128x16xf32> to vector<128x16xf32>
    %69 = arith.addf %65, %68 : vector<128x16xf32>
    %c0_31 = arith.constant 0 : index
    %70 = arith.index_cast %48 : i32 to index
    %c0_32 = arith.constant 0 : index
    %71 = vector.load %arg6[%c0_31, %70, %c0_32] : memref<1x256x16xf32, #tpu.memory_space<vmem>>, vector<1x128x16xf32>
    %72 = vector.shape_cast %71 : vector<1x128x16xf32> to vector<128x16xf32>
    %73 = vector.shape_cast %69 : vector<128x16xf32> to vector<1x128x16xf32>
    tpu.vector_store %arg6[%c0_31, %70, %c0_32], %73 {strides = array<i32>} : memref<1x256x16xf32, #tpu.memory_space<vmem>>, vector<1x128x16xf32>,
    %c2_i32 = arith.constant 2 : i32
    return
  }
  func.func @transform_0(%arg0: i32) -> (i32, i32, i32) {
    %c0_i32 = arith.constant 0 : i32
    %c0_i32_0 = arith.constant 0 : i32
    %c0_i32_1 = arith.constant 0 : i32
    return %arg0, %c0_i32, %c0_i32_0 : i32, i32, i32
  }
  func.func @transform_1(%arg0: i32) -> (i32, i32) {
    %c0_i32 = arith.constant 0 : i32
    %c0_i32_0 = arith.constant 0 : i32
    %c0_i32_1 = arith.constant 0 : i32
    return %c0_i32, %c0_i32_0 : i32, i32
  }
  func.func @transform_2(%arg0: i32) -> (i32, i32) {
    %c0_i32 = arith.constant 0 : i32
    %c0_i32_0 = arith.constant 0 : i32
    %c0_i32_1 = arith.constant 0 : i32
    return %c0_i32, %c0_i32_0 : i32, i32
  }
  func.func @transform_3(%arg0: i32) -> (i32, i32) {
    %c0_i32 = arith.constant 0 : i32
    %c0_i32_0 = arith.constant 0 : i32
    %c0_i32_1 = arith.constant 0 : i32
    return %c0_i32, %c0_i32_0 : i32, i32
  }
  func.func @transform_4(%arg0: i32) -> (i32, i32) {
    %c0_i32 = arith.constant 0 : i32
    %c0_i32_0 = arith.constant 0 : i32
    %c0_i32_1 = arith.constant 0 : i32
    return %c0_i32, %c0_i32_0 : i32, i32
  }
  func.func @transform_5(%arg0: i32) -> (i32, i32, i32) {
    %c0_i32 = arith.constant 0 : i32
    %c0_i32_0 = arith.constant 0 : i32
    %c0_i32_1 = arith.constant 0 : i32
    return %arg0, %c0_i32, %c0_i32_0 : i32, i32, i32
  }
}

</mosaic_0001>

<bundles_post_ra>
// kernel: tpu_custom_call.1
= control target key start
LH: loop header
LB: loop body
LE: loop exit
PB: predicated region body
PF: predicated region fallthrough
CT: control target
= control target key end

     0   :  { %s3344_s18 = smov 0   ;;  %s4123_s0 = inlined_call_operand.vmem [shape: f32[2,256,16], index: 0, kind: input, shape index: {}]   ;;  %s4124_s1 = inlined_call_operand.vmem [shape: f32[16,12], index: 1, kind: input, shape index: {}]   ;;  %s4125_s2 = inlined_call_operand.vmem [shape: f32[1,12], index: 2, kind: input, shape index: {}]   ;;  %s4126_s3 = inlined_call_operand.vmem [shape: f32[8,16], index: 3, kind: input, shape index: {}]   ;;  %s4127_s4 = inlined_call_operand.vmem [shape: f32[1,16], index: 4, kind: input, shape index: {}]   ;;  %s4128_s5 = inlined_call_operand.vmem [shape: f32[2,256,16], index: 5, kind: output, shape index: {}]  }
   0x1 LB: > { %s2415_s19 = sadd.s32 4294967295, %s3310_s18   ;;  %p2419_p0 = scmp.ge.s32.totalorder %s3310_s18, 1  ;;  %s3310_s18 = sphi %s3344_s18, %s15_s18  }
   0x2   : > { %p187_p1 = scmp.lt.s32.totalorder %s3310_s18, 3 }
   0x4   : > { %p188_p2 = pnand %p2419_p0, %p187_p1 }
   0x5   : > { %v257_v0 = vld [vmem:[%s4124_s1] sm:$0xff] (!%p188_p2)  ;;  %v258_v1 = vld [vmem:[%s4124_s1 + $0x8] sm:$0xff] (!%p188_p2)  ;;  %p215_p3 = scmp.lt.s32.totalorder (!%p188_p2), %s2415_s19, 1  ;;  %vm266_vm0 = vcmask (!%p188_p2), 130048   ;;  %vm588_vm1 = vcmask (!%p188_p2), 15360   ;;  %s3312_s30 = smov (!%p188_p2), 126  }
   0x6   : > { %191 = sbr.rel (%p188_p2) target bundleno = 1721 (0x6b9), region = 40  ;;  %v3034_v2 = vpack.c.bf16 (!%p188_p2), %v258_v1, %v257_v0  ;;  %v3435_v35 = vld [vmem:[%s4125_s2] ss:$0 sm:$0xff] (!%p188_p2)  ;;  %s3313_s6 = smov (!%p188_p2), 124   ;;  %vm3599_vm2 = vmpackc.low (!%p188_p2), %vm588_vm1, %vm588_vm1  ;;  %vm896_vm3 = vcmask (!%p188_p2), 523264   ;;  %vm1296_vm4 = vcmask (!%p188_p2), 64512  }
   0x8   : > { %3035 = vmatprep.subr.bf16.mxu0 (!%p188_p2), %v3034_v2 }
   0x9   : > { %3037 = vmatpush3.bf16.msra.mxu0 (!%p188_p2), %v3034_v2 }
   0xd   : > { %s4132_s19 = smov (!%p215_p3, %s2415_s19), 1 }
   0xe   : > { %s2604_s24 = sshll.u32 %s4132_s19, 8 }
   0xf   : > { %s3366_s27 = scalar_lea.vmem %s4123_s0, %s2604_s24  ;;  %s3933_s13 = scalar_lea.vmem %s4128_s5, %s2604_s24 }
  0x10   : > { %v225_v3 = vld [vmem:[%s3366_s27] sm:$0xff]  ;;  %v226_v4 = vld [vmem:[%s3366_s27 + $0x8] sm:$0xff]  ;;  %v227_v5 = vld [vmem:[%s3366_s27 + $0x10] sm:$0xff] }
  0x11   : > { %2774 = vmatprep.mubr.msk.f32.mxu0 %vm266_vm0, %v225_v3  ;;  %v228_v6 = vld [vmem:[%s3366_s27 + $0x18] sm:$0xff]  ;;  %v229_v7 = vld [vmem:[%s3366_s27 + $0x20] sm:$0xff]  ;;  %v230_v8 = vld [vmem:[%s3366_s27 + $0x28] sm:$0xff] }
  0x12   : > { %2775 = vmatmul.mubr.msk.f32.vlgmr.msra.gmra.mrb[0].mxu0 %vm266_vm0, %v226_v4  ;;  %v231_v9 = vld [vmem:[%s3366_s27 + $0x30] sm:$0xff]  ;;  %v232_v10 = vld [vmem:[%s3366_s27 + $0x38] sm:$0xff]  ;;  %v233_v11 = vld [vmem:[%s3366_s27 + $0x40] sm:$0xff] }
  0x13   : > { %2777 = vmatprep.mubr.msk.f32.mxu0 %vm266_vm0, %v227_v5  ;;  %v234_v12 = vld [vmem:[%s3366_s27 + $0x48] sm:$0xff]  ;;  %v235_v13 = vld [vmem:[%s3366_s27 + $0x50] sm:$0xff]  ;;  %v236_v14 = vld [vmem:[%s3366_s27 + $0x58] sm:$0xff] }
  0x14   : > { %v237_v15 = vld [vmem:[%s3366_s27 + $0x60] sm:$0xff]  ;;  %v238_v16 = vld [vmem:[%s3366_s27 + $0x68] sm:$0xff]  ;;  %v239_v17 = vld [vmem:[%s3366_s27 + $0x70] sm:$0xff] }
  0x15   : > { %v240_v18 = vld [vmem:[%s3366_s27 + $0x78] sm:$0xff]  ;;  %v241_v19 = vld [vmem:[%s3366_s27 + $0x80] sm:$0xff]  ;;  %v242_v20 = vld [vmem:[%s3366_s27 + $0x88] sm:$0xff] }
  0x16   : > { %2778 = vmatmul.mubr.msk.f32.gmra.mrb[2].mxu0 %vm266_vm0, %v228_v6  ;;  %v243_v21 = vld [vmem:[%s3366_s27 + $0x90] sm:$0xff]  ;;  %v244_v22 = vld [vmem:[%s3366_s27 + $0x98] sm:$0xff]  ;;  %v245_v23 = vld [vmem:[%s3366_s27 + $0xa0] sm:$0xff] }
  0x17   : > { %2780 = vmatprep.mubr.msk.f32.mxu0 %vm266_vm0, %v229_v7  ;;  %v246_v24 = vld [vmem:[%s3366_s27 + $0xa8] sm:$0xff]  ;;  %v247_v25 = vld [vmem:[%s3366_s27 + $0xb0] sm:$0xff]  ;;  %v248_v26 = vld [vmem:[%s3366_s27 + $0xb8] sm:$0xff] }
  0x18   : > { %v249_v27 = vld [vmem:[%s3366_s27 + $0xc0] sm:$0xff]  ;;  %v250_v28 = vld [vmem:[%s3366_s27 + $0xc8] sm:$0xff]  ;;  %v251_v29 = vld [vmem:[%s3366_s27 + $0xd0] sm:$0xff] }
  0x19   : > { %v252_v30 = vld [vmem:[%s3366_s27 + $0xd8] sm:$0xff]  ;;  %v253_v31 = vld [vmem:[%s3366_s27 + $0xe0] sm:$0xff]  ;;  %v254_v32 = vld [vmem:[%s3366_s27 + $0xe8] sm:$0xff] }
  0x1a   : > { %2781 = vmatmul.mubr.msk.f32.gmra.mrb[4].mxu0 %vm266_vm0, %v230_v8  ;;  %v255_v33 = vld [vmem:[%s3366_s27 + $0xf0] sm:$0xff]  ;;  %v256_v34 = vld [vmem:[%s3366_s27 + $0xf8] sm:$0xff] }
  0x1b   : > { %2783 = vmatprep.mubr.msk.f32.mxu0 %vm266_vm0, %v231_v9 }
  0x1e   : > { %2784 = vmatmul.mubr.msk.f32.gmra.mrb[6].mxu0 %vm266_vm0, %v232_v10 }
  0x1f   : > { %2786 = vmatprep.mubr.msk.f32.mxu0 %vm266_vm0, %v233_v11 }
  0x22   : > { %2787 = vmatmul.mubr.msk.f32.gmra.mrb[8].mxu0 %vm266_vm0, %v234_v12 }
  0x23   : > { %2789 = vmatprep.mubr.msk.f32.mxu0 %vm266_vm0, %v235_v13 }
  0x26   : > { %2790 = vmatmul.mubr.msk.f32.gmra.mrb[10].mxu0 %vm266_vm0, %v236_v14 }
  0x27   : > { %2792 = vmatprep.mubr.msk.f32.mxu0 %vm266_vm0, %v237_v15 }
  0x2a   : > { %2793 = vmatmul.mubr.msk.f32.gmra.mrb[12].mxu0 %vm266_vm0, %v238_v16 }
  0x2b   : > { %2795 = vmatprep.mubr.msk.f32.mxu0 %vm266_vm0, %v239_v17 }
  0x2e   : > { %2796 = vmatmul.mubr.msk.f32.gmra.mrb[14].mxu0 %vm266_vm0, %v240_v18 }
  0x2f   : > { %2798 = vmatprep.mubr.msk.f32.mxu0 %vm266_vm0, %v241_v19 }
  0x32   : > { %2799 = vmatmul.mubr.msk.f32.gmra.mrb[16].mxu0 %vm266_vm0, %v242_v20 }
  0x33   : > { %2801 = vmatprep.mubr.msk.f32.mxu0 %vm266_vm0, %v243_v21 }
  0x36   : > { %2802 = vmatmul.mubr.msk.f32.gmra.mrb[18].mxu0 %vm266_vm0, %v244_v22 }
  0x37   : > { %2804 = vmatprep.mubr.msk.f32.mxu0 %vm266_vm0, %v245_v23 }
  0x3a   : > { %2805 = vmatmul.mubr.msk.f32.gmra.mrb[20].mxu0 %vm266_vm0, %v246_v24 }
  0x3b   : > { %2807 = vmatprep.mubr.msk.f32.mxu0 %vm266_vm0, %v247_v25 }
  0x3e   : > { %2808 = vmatmul.mubr.msk.f32.gmra.mrb[22].mxu0 %vm266_vm0, %v248_v26 }
  0x3f   : > { %2810 = vmatprep.mubr.msk.f32.mxu0 %vm266_vm0, %v249_v27 }
  0x42   : > { %2811 = vmatmul.mubr.msk.f32.gmra.mrb[24].mxu0 %vm266_vm0, %v250_v28 }
  0x43   : > { %2813 = vmatprep.mubr.msk.f32.mxu0 %vm266_vm0, %v251_v29 }
  0x46   : > { %2814 = vmatmul.mubr.msk.f32.gmra.mrb[26].mxu0 %vm266_vm0, %v252_v30 }
  0x47   : > { %2816 = vmatprep.mubr.msk.f32.mxu0 %vm266_vm0, %v253_v31 }
  0x4a   : > { %2817 = vmatmul.mubr.msk.f32.gmra.mrb[28].mxu0 %vm266_vm0, %v254_v32 }
  0x4b   : > { %2819 = vmatprep.mubr.msk.f32.mxu0 %vm266_vm0, %v255_v33 }
  0x4e   : > { %2820 = vmatmul.mubr.msk.f32.gmra.mrb[30].mxu0 %vm266_vm0, %v256_v34 }
  0xe5   : > { %v2776_v36 = vpop.f32.mrb[0].mxu0 }
  0xe6   : > { %v3438_v37 = vadd.f32 %v2776_v36, %v3435_v35  ;;  %v429_v38 = vpop.f32.mrb[1].mxu0 }
  0xe7   : > { %v3441_v39 = vadd.f32 %v3435_v35, %v429_v38 }
  0xe8   : > { %590 = vst.msk [vmem:[#allocation2 + $0x8] sm:$0xff] %vm588_vm1, %v3438_v37 }
  0xe9   : > { %589 = vst.msk [vmem:[#allocation2] sm:$0xff] %vm588_vm1, %v3441_v39  ;;  %v2779_v40 = vpop.f32.mrb[2].mxu0 }
  0xea   : > { %v3448_v41 = vadd.f32 %v2779_v40, %v3435_v35  ;;  %v439_v42 = vpop.f32.mrb[3].mxu0 }
  0xeb   : > { %v3451_v43 = vadd.f32 %v3435_v35, %v439_v42 }
  0xec   : > { %592 = vst.msk [vmem:[#allocation2 + $0x18] sm:$0xff] %vm588_vm1, %v3448_v41 }
  0xed   : > { %591 = vst.msk [vmem:[#allocation2 + $0x10] sm:$0xff] %vm588_vm1, %v3451_v43  ;;  %v2782_v44 = vpop.f32.mrb[4].mxu0 }
  0xee   : > { %v3458_v45 = vadd.f32 %v2782_v44, %v3435_v35  ;;  %v449_v46 = vpop.f32.mrb[5].mxu0 }
  0xef   : > { %v3461_v47 = vadd.f32 %v3435_v35, %v449_v46 }
  0xf0   : > { %594 = vst.msk [vmem:[#allocation2 + $0x28] sm:$0xff] %vm588_vm1, %v3458_v45  ;;  %v647_v48 = vld [vmem:[#allocation2] sm:$0xff] }
  0xf1   : > { %593 = vst.msk [vmem:[#allocation2 + $0x20] sm:$0xff] %vm588_vm1, %v3461_v47  ;;  %v2785_v49 = vpop.f32.mrb[6].mxu0  ;;  %2838 = vmatprep.mubr.msk.f32.mxu0 %vm588_vm1, %v647_v48 }
  0xf2   : > { %v3469_v50 = vadd.f32 %v2785_v49, %v3435_v35  ;;  %v459_v51 = vpop.f32.mrb[7].mxu0 }
  0xf3   : > { %v3472_v52 = vadd.f32 %v3435_v35, %v459_v51 }
  0xf4   : > { %596 = vst.msk [vmem:[#allocation2 + $0x38] sm:$0xff] %vm588_vm1, %v3469_v50 }
  0xf5   : > { %595 = vst.msk [vmem:[#allocation2 + $0x30] sm:$0xff] %vm588_vm1, %v3472_v52  ;;  %v2788_v53 = vpop.f32.mrb[8].mxu0 }
  0xf6   : > { %v3479_v54 = vadd.f32 %v2788_v53, %v3435_v35  ;;  %v469_v55 = vpop.f32.mrb[9].mxu0 }
  0xf7   : > { %v3482_v56 = vadd.f32 %v3435_v35, %v469_v55 }
  0xf8   : > { %598 = vst.msk [vmem:[#allocation2 + $0x48] sm:$0xff] %vm588_vm1, %v3479_v54  ;;  %v622_v57 = vmax.f32 %v3438_v37, %v3479_v54 }
  0xf9   : > { %597 = vst.msk [vmem:[#allocation2 + $0x40] sm:$0xff] %vm588_vm1, %v3482_v56  ;;  %v621_v58 = vmax.f32 %v3441_v39, %v3482_v56  ;;  %v2791_v59 = vpop.f32.mrb[10].mxu0 }
  0xfa   : > { %v3493_v60 = vadd.f32 %v2791_v59, %v3435_v35  ;;  %v479_v61 = vpop.f32.mrb[11].mxu0 }
  0xfb   : > { %v3496_v62 = vadd.f32 %v3435_v35, %v479_v61 }
  0xfc   : > { %600 = vst.msk [vmem:[#allocation2 + $0x58] sm:$0xff] %vm588_vm1, %v3493_v60  ;;  %v624_v63 = vmax.f32 %v3448_v41, %v3493_v60 }
  0xfd   : > { %599 = vst.msk [vmem:[#allocation2 + $0x50] sm:$0xff] %vm588_vm1, %v3496_v62  ;;  %v623_v0 = vmax.f32 %v3451_v43, %v3496_v62  ;;  %v2794_v1 = vpop.f32.mrb[12].mxu0 }
  0xfe   : > { %v3507_v2 = vadd.f32 %v2794_v1, %v3435_v35  ;;  %v489_v3 = vpop.f32.mrb[13].mxu0 }
  0xff   : > { %v3510_v4 = vadd.f32 %v3435_v35, %v489_v3 }
 0x100   : > { %602 = vst.msk [vmem:[#allocation2 + $0x68] sm:$0xff] %vm588_vm1, %v3507_v2  ;;  %v626_v5 = vmax.f32 %v3458_v45, %v3507_v2  ;;  %v655_v6 = vld [vmem:[#allocation2 + $0x40] sm:$0xff] }
 0x101   : > { %601 = vst.msk [vmem:[#allocation2 + $0x60] sm:$0xff] %vm588_vm1, %v3510_v4  ;;  %v625_v7 = vmax.f32 %v3461_v47, %v3510_v4  ;;  %v2797_v8 = vpop.f32.mrb[14].mxu0  ;;  %2850 = vmatprep.mubr.msk.f32.mxu1 %vm588_vm1, %v655_v6 }
 0x102   : > { %v3522_v9 = vadd.f32 %v2797_v8, %v3435_v35  ;;  %v499_v10 = vpop.f32.mrb[15].mxu0 }
 0x103   : > { %v3525_v11 = vadd.f32 %v3435_v35, %v499_v10 }
 0x104   : > { %604 = vst.msk [vmem:[#allocation2 + $0x78] sm:$0xff] %vm588_vm1, %v3522_v9  ;;  %v628_v12 = vmax.f32 %v3469_v50, %v3522_v9 }
 0x105   : > { %603 = vst.msk [vmem:[#allocation2 + $0x70] sm:$0xff] %vm588_vm1, %v3525_v11  ;;  %v627_v13 = vmax.f32 %v3472_v52, %v3525_v11  ;;  %v2800_v14 = vpop.f32.mrb[16].mxu0 }
 0x106   : > { %v515_v15 = vadd.f32 %v2800_v14, %v3435_v35  ;;  %v509_v16 = vpop.f32.mrb[17].mxu0 }
 0x107   : > { %v510_v17 = vadd.f32 %v3435_v35, %v509_v16 }
 0x108   : > { %606 = vst.msk [vmem:[#allocation2 + $0x88] sm:$0xff] %vm588_vm1, %v515_v15 }
 0x109   : > { %605 = vst.msk [vmem:[#allocation2 + $0x80] sm:$0xff] %vm588_vm1, %v510_v17  ;;  %v2803_v18 = vpop.f32.mrb[18].mxu0 }
 0x10a   : > { %v525_v19 = vadd.f32 %v2803_v18, %v3435_v35  ;;  %v519_v20 = vpop.f32.mrb[19].mxu0 }
 0x10b   : > { %v520_v21 = vadd.f32 %v3435_v35, %v519_v20 }
 0x10c   : > { %608 = vst.msk [vmem:[#allocation2 + $0x98] sm:$0xff] %vm588_vm1, %v525_v19 }
 0x10d   : > { %607 = vst.msk [vmem:[#allocation2 + $0x90] sm:$0xff] %vm588_vm1, %v520_v21  ;;  %v2806_v22 = vpop.f32.mrb[20].mxu0 }
 0x10e   : > { %v535_v23 = vadd.f32 %v2806_v22, %v3435_v35  ;;  %v529_v24 = vpop.f32.mrb[21].mxu0  ;;  %v3656_v22 = vld [vmem:[%s4126_s3] sm:$0xff] }
 0x10f   : > { %v530_v25 = vadd.f32 %v3435_v35, %v529_v24 }
 0x110   : > { %610 = vst.msk [vmem:[#allocation2 + $0xa8] sm:$0xff] %vm588_vm1, %v535_v23 }
 0x111   : > { %609 = vst.msk [vmem:[#allocation2 + $0xa0] sm:$0xff] %vm588_vm1, %v530_v25  ;;  %v2809_v26 = vpop.f32.mrb[22].mxu0 }
 0x112   : > { %v545_v27 = vadd.f32 %v2809_v26, %v3435_v35  ;;  %v539_v28 = vpop.f32.mrb[23].mxu0 }
 0x113   : > { %v540_v29 = vadd.f32 %v3435_v35, %v539_v28  ;;  %v648_v28 = vld [vmem:[#allocation2 + $0x8] sm:$0xff] }
 0x114   : > { %612 = vst.msk [vmem:[#allocation2 + $0xb8] sm:$0xff] %vm588_vm1, %v545_v27 }
 0x115   : > { %611 = vst.msk [vmem:[#allocation2 + $0xb0] sm:$0xff] %vm588_vm1, %v540_v29  ;;  %v2812_v30 = vpop.f32.mrb[24].mxu0 }
 0x116   : > { %v555_v31 = vadd.f32 %v2812_v30, %v3435_v35  ;;  %v549_v32 = vpop.f32.mrb[25].mxu0  ;;  %v649_v30 = vld [vmem:[#allocation2 + $0x10] sm:$0xff] }
 0x117   : > { %v550_v33 = vadd.f32 %v3435_v35, %v549_v32 }
 0x118   : > { %614 = vst.msk [vmem:[#allocation2 + $0xc8] sm:$0xff] %vm588_vm1, %v555_v31  ;;  %v630_v34 = vmax.f32 %v515_v15, %v555_v31  ;;  %v657_v31 = vld [vmem:[#allocation2 + $0x50] sm:$0xff] }
 0x119   : > { %613 = vst.msk [vmem:[#allocation2 + $0xc0] sm:$0xff] %vm588_vm1, %v550_v33  ;;  %v629_v36 = vmax.f32 %v510_v17, %v550_v33  ;;  %v2815_v38 = vpop.f32.mrb[26].mxu0 }
 0x11a   : > { %v565_v40 = vadd.f32 %v2815_v38, %v3435_v35  ;;  %v559_v42 = vpop.f32.mrb[27].mxu0  ;;  %v638_v44 = vmax.f32 %v622_v57, %v630_v34  ;;  %v658_v38 = vld [vmem:[#allocation2 + $0x58] sm:$0xff] }
 0x11b   : > { %v560_v46 = vadd.f32 %v3435_v35, %v559_v42  ;;  %v637_v48 = vmax.f32 %v621_v58, %v629_v36  ;;  %v650_v36 = vld [vmem:[#allocation2 + $0x18] sm:$0xff]  ;;  %v659_v42 = vld [vmem:[#allocation2 + $0x60] sm:$0xff] }
 0x11c   : > { %616 = vst.msk [vmem:[#allocation2 + $0xd8] sm:$0xff] %vm588_vm1, %v565_v40  ;;  %v632_v49 = vmax.f32 %v525_v19, %v565_v40  ;;  %v651_v40 = vld [vmem:[#allocation2 + $0x20] sm:$0xff] }
 0x11d   : > { %615 = vst.msk [vmem:[#allocation2 + $0xd0] sm:$0xff] %vm588_vm1, %v560_v46  ;;  %v631_v51 = vmax.f32 %v520_v21, %v560_v46  ;;  %v2818_v53 = vpop.f32.mrb[28].mxu0  ;;  %v3136_v55 = vpack.i.bf16 %v638_v44, %v637_v48  ;;  %v652_v46 = vld [vmem:[#allocation2 + $0x28] sm:$0xff] }
 0x11e   : > { %v640_v59 = vmax.f32 %v624_v63, %v632_v49  ;;  %v575_v37 = vadd.f32 %v2818_v53, %v3435_v35  ;;  %v569_v54 = vpop.f32.mrb[29].mxu0  ;;  %v660_v48 = vld [vmem:[#allocation2 + $0x68] sm:$0xff]  ;;  %v653_v49 = vld [vmem:[#allocation2 + $0x30] sm:$0xff]  ;;  %v654_v53 = vld [vmem:[#allocation2 + $0x38] sm:$0xff] }
 0x11f   : > { %v639_v39 = vmax.f32 %v623_v0, %v631_v51  ;;  %v570_v56 = vadd.f32 %v3435_v35, %v569_v54  ;;  %3137 = vrot.lane.b32.xlu0 %v3136_v55, %s3312_s30  ;;  %v661_v51 = vld [vmem:[#allocation2 + $0x70] sm:$0xff] }
 0x120   : > { %618 = vst.msk [vmem:[#allocation2 + $0xe8] sm:$0xff] %vm588_vm1, %v575_v37  ;;  %v634_v57 = vmax.f32 %v535_v23, %v575_v37 }
 0x121   : > { %617 = vst.msk [vmem:[#allocation2 + $0xe0] sm:$0xff] %vm588_vm1, %v570_v56  ;;  %v633_v58 = vmax.f32 %v530_v25, %v570_v56  ;;  %v2821_v61 = vpop.f32.mrb[30].mxu0  ;;  %v3141_v41 = vpack.i.bf16 %v640_v59, %v639_v39 }
 0x122   : > { %v585_v60 = vadd.f32 %v2821_v61, %v3435_v35  ;;  %v579_v63 = vpop.f32.mrb[31].mxu0  ;;  %v642_v43 = vmax.f32 %v626_v5, %v634_v57 }
 0x123   : > { %v580_v62 = vadd.f32 %v3435_v35, %v579_v63  ;;  %3142 = vrot.lane.b32.xlu0 %v3141_v41, %s3312_s30  ;;  %v641_v0 = vmax.f32 %v625_v7, %v633_v58 }
 0x124   : > { %620 = vst.msk [vmem:[#allocation2 + $0xf8] sm:$0xff] %vm588_vm1, %v585_v60  ;;  %v636_v1 = vmax.f32 %v545_v27, %v585_v60 }
 0x125   : > { %619 = vst.msk [vmem:[#allocation2 + $0xf0] sm:$0xff] %vm588_vm1, %v580_v62  ;;  %v635_v3 = vmax.f32 %v540_v29, %v580_v62  ;;  %v3146_v6 = vpack.i.bf16 %v642_v43, %v641_v0  ;;  %v656_v29 = vld [vmem:[#allocation2 + $0x48] sm:$0xff] }
 0x126   : > { %v644_v8 = vmax.f32 %v628_v12, %v636_v1 }
 0x127   : > { %v643_v35 = vmax.f32 %v627_v13, %v635_v3  ;;  %3147 = vrot.lane.b32.xlu1 %v3146_v6, %s3312_s30  ;;  %3162 = vrot.lane.b32.xlu0 %v3141_v41, %s3313_s6 }
 0x129   : > { %v3592_v45 = vpack.i.bf16 %v644_v8, %v643_v35 }
 0x12b   : > { %3152 = vrot.lane.b32.xlu1 %v3592_v45, %s3312_s30 }
 0x12f   : > { %3157 = vrot.lane.b32.xlu1 %v3136_v55, %s3313_s6  ;;  %v662_v55 = vld [vmem:[#allocation2 + $0x78] sm:$0xff] }
 0x133   : > { %3167 = vrot.lane.b32.xlu1 %v3146_v6, %s3313_s6 }
 0x191   : > { %v3138_v47 = vpop.permute.xlu0 %3137 }
 0x192   : > { %v3140_v2 = vunpack.i.h.bf16 %v3138_v47  ;;  %v3139_v50 = vunpack.i.l.bf16 %v3138_v47 }
 0x194   : > { %v3603_v4 = vpack.c.bf16 %v3140_v2, %v3139_v50 }
 0x195   : > { %v3143_v5 = vpop.permute.xlu0 %3142 }
 0x196   : > { %v3145_v7 = vunpack.i.h.bf16 %v3143_v5  ;;  %v3144_v9 = vunpack.i.l.bf16 %v3143_v5  ;;  %3040 = vmatprep.subr.msk.bf16.mxu0 %vm3599_vm2, %v3603_v4  ;;  %3118 = vmatprep.subr.msk.bf16.mxu1 %vm3599_vm2, %v3603_v4 }
 0x197   : > { %3043 = vmatpush3.bf16.xpose.msk.msra.mxu0 %vm3599_vm2, %v3603_v4  ;;  %3122 = vmatpush3.bf16.xpose.msk.msra.mxu1 %vm3599_vm2, %v3603_v4 }
 0x198   : > { %v3617_v10 = vpack.c.bf16 %v3145_v7, %v3144_v9 }
 0x199   : > { %v3148_v11 = vpop.permute.xlu1 %3147  ;;  %v3163_v24 = vpop.permute.xlu0 %3162 }
 0x19a   : > { %v3150_v12 = vunpack.i.h.bf16 %v3148_v11  ;;  %v3149_v13 = vunpack.i.l.bf16 %v3148_v11  ;;  %3046 = vmatprep.subr.msk.bf16.mxu0 %vm3599_vm2, %v3617_v10  ;;  %3119 = vmatprep.subr.msk.bf16.mxu1 %vm3599_vm2, %v3617_v10  ;;  %v3165_v25 = vunpack.i.h.bf16 %v3163_v24  ;;  %v3164_v26 = vunpack.i.l.bf16 %v3163_v24 }
 0x19c   : > { %v3625_v14 = vpack.c.bf16 %v3150_v12, %v3149_v13  ;;  %v3670_v32 = vpack.c.bf16 %v3165_v25, %v3164_v26 }
 0x19d   : > { %v3153_v15 = vpop.permute.xlu1 %3152 }
 0x19e   : > { %v3155_v16 = vunpack.i.h.bf16 %v3153_v15  ;;  %v3154_v17 = vunpack.i.l.bf16 %v3153_v15 }
 0x19f   : > { %3049 = vmatpush3.bf16.xpose.msk.msra.mxu0 %vm3599_vm2, %v3617_v10  ;;  %3123 = vmatpush3.bf16.xpose.msk.msra.mxu1 %vm3599_vm2, %v3617_v10 }
 0x1a0   : > { %3052 = vmatprep.subr.msk.bf16.mxu0 %vm3599_vm2, %v3625_v14  ;;  %3120 = vmatprep.subr.msk.bf16.mxu1 %vm3599_vm2, %v3625_v14  ;;  %v3639_v18 = vpack.c.bf16 %v3155_v16, %v3154_v17 }
 0x1a1   : > { %v3158_v19 = vpop.permute.xlu1 %3157 }
 0x1a2   : > { %v3160_v20 = vunpack.i.h.bf16 %v3158_v19  ;;  %v3159_v21 = vunpack.i.l.bf16 %v3158_v19 }
 0x1a4   : > { %v3658_v23 = vpack.c.bf16 %v3160_v20, %v3159_v21 }
 0x1a5   : > { %v3168_v27 = vpop.permute.xlu1 %3167 }
 0x1a6   : > { %v3170_v33 = vunpack.i.h.bf16 %v3168_v27  ;;  %v3169_v34 = vunpack.i.l.bf16 %v3168_v27 }
 0x1a7   : > { %3055 = vmatpush3.bf16.xpose.msk.msra.mxu0 %vm3599_vm2, %v3625_v14  ;;  %3124 = vmatpush3.bf16.xpose.msk.msra.mxu1 %vm3599_vm2, %v3625_v14 }
 0x1a8   : > { %3058 = vmatprep.subr.msk.bf16.mxu0 %vm3599_vm2, %v3639_v18  ;;  %3121 = vmatprep.subr.msk.bf16.mxu1 %vm3599_vm2, %v3639_v18  ;;  %v3680_v44 = vpack.c.bf16 %v3170_v33, %v3169_v34 }
 0x1af   : > { %3061 = vmatpush3.bf16.xpose.msk.msra.mxu0 %vm3599_vm2, %v3639_v18  ;;  %3125 = vmatpush3.bf16.xpose.msk.msra.mxu1 %vm3599_vm2, %v3639_v18 }
 0x1b0   : > { %3063 = vmatprep.subr.bf16.mxu1 %v3658_v23  ;;  %2902 = vmatprep.subr.mxu0 %v3656_v22 }
 0x1b6   : > { %2839 = vmatmul.mubr.msk.f32.vlgmr.msra.gmra.mrb[32].mxu0 %vm588_vm1, %v648_v28  ;;  %2851 = vmatmul.mubr.msk.f32.vlgmr.msra.gmra.mrb[0].mxu1 %vm588_vm1, %v656_v29 }
 0x1b7   : > { %2841 = vmatprep.mubr.msk.f32.mxu0 %vm588_vm1, %v649_v30  ;;  %2853 = vmatprep.mubr.msk.f32.mxu1 %vm588_vm1, %v657_v31 }
 0x1b8   : > { %3065 = vmatpush3.bf16.msra.mxu1 %v3658_v23  ;;  %2903 = vmatpush3.msra.mxu0 %v3656_v22 }
 0x1b9   : > { %3067 = vmatprep.subr.bf16.mxu1 %v3670_v32  ;;  %3103 = vmatprep.subr.bf16.mxu0 %v3658_v23 }
 0x1ba   : > { %2842 = vmatmul.mubr.msk.f32.gmra.mrb[34].mxu0 %vm588_vm1, %v650_v36  ;;  %2854 = vmatmul.mubr.msk.f32.gmra.mrb[2].mxu1 %vm588_vm1, %v658_v38 }
 0x1bb   : > { %2844 = vmatprep.mubr.msk.f32.mxu0 %vm588_vm1, %v651_v40  ;;  %2856 = vmatprep.mubr.msk.f32.mxu1 %vm588_vm1, %v659_v42 }
 0x1bc   : > { %3069 = vmatpush3.bf16.msra.mxu1 %v3670_v32 }
 0x1bd   : > { %3071 = vmatprep.subr.bf16.mxu1 %v3680_v44 }
 0x1be   : > { %2845 = vmatmul.mubr.msk.f32.gmra.mrb[36].mxu0 %vm588_vm1, %v652_v46  ;;  %2857 = vmatmul.mubr.msk.f32.gmra.mrb[4].mxu1 %vm588_vm1, %v660_v48 }
 0x1bf   : > { %2847 = vmatprep.mubr.msk.f32.mxu0 %vm588_vm1, %v653_v49  ;;  %2859 = vmatprep.mubr.msk.f32.mxu1 %vm588_vm1, %v661_v51 }
 0x1c0   : > { %3073 = vmatpush3.bf16.msra.mxu1 %v3680_v44 }
 0x1c2   : > { %2848 = vmatmul.mubr.msk.f32.gmra.mrb[38].mxu0 %vm588_vm1, %v654_v53  ;;  %2860 = vmatmul.mubr.msk.f32.gmra.mrb[6].mxu1 %vm588_vm1, %v662_v55 }
 0x289   : > { %v2840_v59 = vpop.f32.mrb[32].mxu0  ;;  %v3693_v37 = vpop.f32.mrb[0].mxu1 }
 0x28a   : > { %v817_v54 = vpop.f32.mrb[33].mxu0  ;;  %v3695_v39 = vpop.f32.mrb[1].mxu1  ;;  %v924_v56 = vsel %vm896_vm3, %v3693_v37, -inf  ;;  %v900_v57 = vsel %vm896_vm3, %v2840_v59, -inf }
 0x28b   : > { %925 = vmax.xlane.f32.xlu0 %v924_v56  ;;  %901 = vmax.xlane.f32.xlu1 %v900_v57  ;;  %v897_v63 = vsel %vm896_vm3, %v817_v54, -inf  ;;  %v921_v3 = vsel %vm896_vm3, %v3695_v39, -inf }
 0x28d   : > { %v2843_v58 = vpop.f32.mrb[34].mxu0  ;;  %v3700_v61 = vpop.f32.mrb[2].mxu1 }
 0x28e   : > { %v3702_v41 = vpop.f32.mrb[35].mxu0  ;;  %v3704_v60 = vpop.f32.mrb[3].mxu1  ;;  %v906_v2 = vsel %vm896_vm3, %v2843_v58, -inf }
 0x28f   : > { %898 = vmax.xlane.f32.xlu0 %v897_v63  ;;  %v903_v5 = vsel %vm896_vm3, %v3702_v41, -inf  ;;  %v927_v12 = vsel %vm896_vm3, %v3704_v60, -inf }
 0x291   : > { %v3707_v43 = vpop.f32.mrb[36].mxu0  ;;  %v3709_v62 = vpop.f32.mrb[4].mxu1 }
 0x292   : > { %v3711_v0 = vpop.f32.mrb[37].mxu0  ;;  %v3713_v1 = vpop.f32.mrb[5].mxu1  ;;  %v912_v7 = vsel %vm896_vm3, %v3707_v43, -inf  ;;  %v936_v15 = vsel %vm896_vm3, %v3709_v62, -inf }
 0x293   : > { %922 = vmax.xlane.f32.xlu0 %v921_v3  ;;  %v909_v9 = vsel %vm896_vm3, %v3711_v0, -inf  ;;  %v933_v13 = vsel %vm896_vm3, %v3713_v1, -inf }
 0x295   : > { %v3717_v6 = vpop.f32.mrb[38].mxu0  ;;  %v3719_v8 = vpop.f32.mrb[6].mxu1 }
 0x296   : > { %v3721_v35 = vpop.f32.mrb[39].mxu0  ;;  %v3723_v47 = vpop.f32.mrb[7].mxu1  ;;  %v918_v11 = vsel %vm896_vm3, %v3717_v6, -inf  ;;  %v942_v17 = vsel %vm896_vm3, %v3719_v8, -inf }
 0x297   : > { %907 = vmax.xlane.f32.xlu0 %v906_v2  ;;  %v915_v50 = vsel %vm896_vm3, %v3721_v35, -inf  ;;  %v939_v16 = vsel %vm896_vm3, %v3723_v47, -inf }
 0x298   : > { %916 = vmax.xlane.f32.xlu1 %v915_v50 }
 0x29b   : > { %904 = vmax.xlane.f32.xlu0 %v903_v5 }
 0x29f   : > { %913 = vmax.xlane.f32.xlu0 %v912_v7 }
 0x2a3   : > { %910 = vmax.xlane.f32.xlu0 %v909_v9 }
 0x2a7   : > { %919 = vmax.xlane.f32.xlu0 %v918_v11 }
 0x2a9   : > { %3172 = vrot.lane.b32.xlu1 %v3592_v45, %s3313_s6  ;;  %v930_v45 = vsel %vm896_vm3, %v3700_v61, -inf }
 0x2ab   : > { %928 = vmax.xlane.f32.xlu0 %v927_v12 }
 0x2af   : > { %934 = vmax.xlane.f32.xlu0 %v933_v13 }
 0x2b3   : > { %937 = vmax.xlane.f32.xlu0 %v936_v15 }
 0x2b7   : > { %940 = vmax.xlane.f32.xlu0 %v939_v16 }
 0x2bb   : > { %943 = vmax.xlane.f32.xlu0 %v942_v17 }
 0x2cd   : > { %931 = vmax.xlane.f32.xlu1 %v930_v45 }
 0x318   : > { %v926_v19 = vpop.xlane.xlu0 %925  ;;  %v902_v20 = vpop.xlane.xlu1 %901 }
 0x319   : > { %v946_v21 = vsub.f32 %v2840_v59, %v902_v20  ;;  %v954_v63 = vsub.f32 %v3693_v37, %v926_v19 }
 0x31b   : > { %v963_v24 = vmul.f32 1.442695, %v946_v21  ;;  %v979_v9 = vmul.f32 1.442695, %v954_v63  ;;  %v1543_v63 = vld [vmem:[#allocation2 + $0xa0] sm:$0xff] }
 0x31c   : > { %v899_v25 = vpop.xlane.xlu0 %898 }
 0x31d   : > { %v945_v26 = vsub.f32 %v817_v54, %v899_v25  ;;  %3176 = vpow2.f32 %v963_v24 }
 0x31f   : > { %v961_v27 = vmul.f32 1.442695, %v945_v26 }
 0x320   : > { %v923_v28 = vpop.xlane.xlu0 %922 }
 0x321   : > { %3178 = vpow2.f32 %v961_v27  ;;  %v953_v3 = vsub.f32 %v3695_v39, %v923_v28 }
 0x323   : > { %v977_v12 = vmul.f32 1.442695, %v953_v3  ;;  %v1545_v3 = vld [vmem:[#allocation2 + $0xb0] sm:$0xff] }
 0x324   : > { %v908_v29 = vpop.xlane.xlu0 %907 }
 0x325   : > { %v948_v30 = vsub.f32 %v2843_v58, %v908_v29  ;;  %v917_v31 = vpop.xlane.xlu1 %916 }
 0x326   : > { %v951_v56 = vsub.f32 %v3721_v35, %v917_v31 }
 0x327   : > { %v967_v33 = vmul.f32 1.442695, %v948_v30  ;;  %v3177_v34 = vpop.eup %3176 }
 0x328   : > { %v905_v36 = vpop.xlane.xlu0 %904  ;;  %v996_v40 = vsel %vm896_vm3, %v3177_v34, 0.0  ;;  %v973_v2 = vmul.f32 1.442695, %v951_v56  ;;  %v1539_v56 = vld [vmem:[#allocation2 + $0x80] sm:$0xff] }
 0x329   : > { %3180 = vpow2.f32 %v967_v33  ;;  %v947_v38 = vsub.f32 %v3702_v41, %v905_v36  ;;  %v3173_v42 = vpop.permute.xlu1 %3172  ;;  %997 = vadd.xlane.f32.xlu0 %v996_v40 }
 0x32a   : > { %v3175_v46 = vunpack.i.h.bf16 %v3173_v42  ;;  %v3174_v48 = vunpack.i.l.bf16 %v3173_v42 }
 0x32b   : > { %v3179_v49 = vpop.eup %3178  ;;  %v965_v51 = vmul.f32 1.442695, %v947_v38 }
 0x32c   : > { %v3752_v53 = vpack.c.bf16 %v3175_v46, %v3174_v48  ;;  %2878 = vmatprep.mubr.msk.f32.mxu1 %vm896_vm3, %v3179_v49  ;;  %v914_v55 = vpop.xlane.xlu0 %913  ;;  %v993_v59 = vsel %vm896_vm3, %v3179_v49, 0.0 }
 0x32d   : > { %3182 = vpow2.f32 %v965_v51  ;;  %v950_v54 = vsub.f32 %v3707_v43, %v914_v55  ;;  %994 = vadd.xlane.f32.xlu0 %v993_v59 }
 0x32e   : > { %3075 = vmatprep.subr.bf16.mxu1 %v3752_v53 }
 0x32f   : > { %v971_v57 = vmul.f32 1.442695, %v950_v54  ;;  %3077 = vmatpush3.bf16.msra.mxu1 %v3752_v53 }
 0x330   : > { %v911_v58 = vpop.xlane.xlu0 %910  ;;  %3080 = vmatprep.subr.msk.bf16.mxu1 %vm3599_vm2, %v3603_v4 }
 0x331   : > { %3184 = vpow2.f32 %v971_v57  ;;  %v949_v41 = vsub.f32 %v3711_v0, %v911_v58  ;;  %v1540_v57 = vld [vmem:[#allocation2 + $0x88] sm:$0xff]  ;;  %v1541_v58 = vld [vmem:[#allocation2 + $0x90] sm:$0xff] }
 0x332   : > { %2879 = vmatmul.mubr.msk.f32.vlgmr.msra.gmra.mrb[8].mxu1 %vm896_vm3, %v3177_v34 }
 0x333   : > { %v3181_v43 = vpop.eup %3180  ;;  %v969_v35 = vmul.f32 1.442695, %v949_v41  ;;  %v1542_v41 = vld [vmem:[#allocation2 + $0x98] sm:$0xff] }
 0x334   : > { %v920_v50 = vpop.xlane.xlu0 %919  ;;  %v1002_v5 = vsel %vm896_vm3, %v3181_v43, 0.0 }
 0x335   : > { %3186 = vpow2.f32 %v969_v35  ;;  %v952_v7 = vsub.f32 %v3717_v6, %v920_v50  ;;  %1003 = vadd.xlane.f32.xlu0 %v1002_v5  ;;  %v1547_v35 = vld [vmem:[#allocation2 + $0xc0] sm:$0xff]  ;;  %v1548_v50 = vld [vmem:[#allocation2 + $0xc8] sm:$0xff]  ;;  %v1550_v5 = vld [vmem:[#allocation2 + $0xd8] sm:$0xff] }
 0x336   : > { %3188 = vpow2.f32 %v973_v2  ;;  %v1546_v2 = vld [vmem:[#allocation2 + $0xb8] sm:$0xff] }
 0x337   : > { %v3183_v11 = vpop.eup %3182  ;;  %v975_v0 = vmul.f32 1.442695, %v952_v7  ;;  %v1551_v7 = vld [vmem:[#allocation2 + $0xe0] sm:$0xff] }
 0x338   : > { %v929_v37 = vpop.xlane.xlu0 %928  ;;  %2881 = vmatprep.mubr.msk.f32.mxu1 %vm896_vm3, %v3183_v11  ;;  %3083 = vmatpush3.bf16.xpose.msk.msra.mxu1 %vm3599_vm2, %v3603_v4  ;;  %v999_v39 = vsel %vm896_vm3, %v3183_v11, 0.0  ;;  %v1553_v11 = vld [vmem:[#allocation2 + $0xf0] sm:$0xff] }
 0x339   : > { %3190 = vpow2.f32 %v975_v0  ;;  %v955_v13 = vsub.f32 %v3704_v60, %v929_v37  ;;  %1000 = vadd.xlane.f32.xlu0 %v999_v39  ;;  %2882 = vmatmul.mubr.msk.f32.gmra.mrb[10].mxu1 %vm896_vm3, %v3181_v43  ;;  %v1544_v43 = vld [vmem:[#allocation2 + $0xa8] sm:$0xff] }
 0x33a   : > { %3192 = vpow2.f32 %v979_v9  ;;  %3086 = vmatprep.subr.msk.bf16.mxu1 %vm3599_vm2, %v3617_v10  ;;  %v1552_v9 = vld [vmem:[#allocation2 + $0xe8] sm:$0xff] }
 0x33b   : > { %v3185_v6 = vpop.eup %3184  ;;  %3194 = vpow2.f32 %v977_v12  ;;  %v981_v15 = vmul.f32 1.442695, %v955_v13  ;;  %v1554_v12 = vld [vmem:[#allocation2 + $0xf8] sm:$0xff] }
 0x33c   : > { %v935_v16 = vpop.xlane.xlu0 %934  ;;  %v1008_v17 = vsel %vm896_vm3, %v3185_v6, 0.0 }
 0x33d   : > { %v957_v4 = vsub.f32 %v3713_v1, %v935_v16  ;;  %1009 = vadd.xlane.f32.xlu1 %v1008_v17  ;;  %3196 = vpow2.f32 %v981_v15 }
 0x33f   : > { %v3187_v45 = vpop.eup %3186  ;;  %v985_v60 = vmul.f32 1.442695, %v957_v4 }
 0x340   : > { %v938_v19 = vpop.xlane.xlu0 %937  ;;  %2884 = vmatprep.mubr.msk.f32.mxu1 %vm896_vm3, %v3187_v45  ;;  %3089 = vmatpush3.bf16.xpose.msk.msra.mxu1 %vm3599_vm2, %v3617_v10  ;;  %v1005_v20 = vsel %vm896_vm3, %v3187_v45, 0.0  ;;  %v3189_v21 = vpop.eup %3188 }
 0x341   : > { %1006 = vadd.xlane.f32.xlu0 %v1005_v20  ;;  %2885 = vmatmul.mubr.msk.f32.gmra.mrb[12].mxu1 %vm896_vm3, %v3185_v6  ;;  %3198 = vpow2.f32 %v985_v60  ;;  %v1011_v10 = vsel %vm896_vm3, %v3189_v21, 0.0  ;;  %v958_v40 = vsub.f32 %v3709_v62, %v938_v19 }
 0x342   : > { %3092 = vmatprep.subr.msk.bf16.mxu1 %vm3599_vm2, %v3625_v14  ;;  %2887 = vmatprep.mubr.msk.f32.mxu1 %vm896_vm3, %v3189_v21 }
 0x343   : > { %v3191_v1 = vpop.eup %3190  ;;  %v987_v49 = vmul.f32 1.442695, %v958_v40 }
 0x344   : > { %v3193_v24 = vpop.eup %3192  ;;  %v941_v25 = vpop.xlane.xlu0 %940  ;;  %v1014_v26 = vsel %vm896_vm3, %v3191_v1, 0.0 }
 0x345   : > { %v3195_v27 = vpop.eup %3194  ;;  %v959_v28 = vsub.f32 %v3723_v47, %v941_v25  ;;  %1015 = vadd.xlane.f32.xlu1 %v1014_v26  ;;  %1012 = vadd.xlane.f32.xlu0 %v1011_v10  ;;  %v1020_v30 = vsel %vm896_vm3, %v3193_v24, 0.0 }
 0x346   : > { %2888 = vmatmul.mubr.msk.f32.gmra.mrb[14].mxu1 %vm896_vm3, %v3191_v1  ;;  %v1017_v31 = vsel %vm896_vm3, %v3195_v27, 0.0 }
 0x347   : > { %v989_v29 = vmul.f32 1.442695, %v959_v28  ;;  %2890 = vmatprep.mubr.msk.f32.mxu1 %vm896_vm3, %v3195_v27  ;;  %v3197_v33 = vpop.eup %3196 }
 0x348   : > { %3095 = vmatpush3.bf16.xpose.msk.msra.mxu1 %vm3599_vm2, %v3625_v14  ;;  %v1023_v47 = vsel %vm896_vm3, %v3197_v33, 0.0  ;;  %v944_v42 = vpop.xlane.xlu0 %943 }
 0x349   : > { %3200 = vpow2.f32 %v989_v29  ;;  %1021 = vadd.xlane.f32.xlu1 %v1020_v30  ;;  %1018 = vadd.xlane.f32.xlu0 %v1017_v31  ;;  %v960_v51 = vsub.f32 %v3719_v8, %v944_v42 }
 0x34a   : > { %2891 = vmatmul.mubr.msk.f32.gmra.mrb[16].mxu1 %vm896_vm3, %v3193_v24  ;;  %3098 = vmatprep.subr.msk.bf16.mxu1 %vm3599_vm2, %v3639_v18 }
 0x34b   : > { %2893 = vmatprep.mubr.msk.f32.mxu1 %vm896_vm3, %v3197_v33  ;;  %v3199_v34 = vpop.eup %3198 }
 0x34c   : > { %v1029_v14 = vsel %vm896_vm3, %v3199_v34, 0.0 }
 0x34d   : > { %1024 = vadd.xlane.f32.xlu0 %v1023_v47 }
 0x350   : > { %3101 = vmatpush3.bf16.xpose.msk.msra.mxu1 %vm3599_vm2, %v3639_v18  ;;  %v991_v18 = vmul.f32 1.442695, %v960_v51 }
 0x351   : > { %1030 = vadd.xlane.f32.xlu0 %v1029_v14  ;;  %3008 = vmatprep.subr.mxu1 %v3656_v22 }
 0x353   : > { %v3201_v36 = vpop.eup %3200 }
 0x354   : > { %v1035_v38 = vsel %vm896_vm3, %v3201_v36, 0.0 }
 0x355   : > { %1036 = vadd.xlane.f32.xlu0 %v1035_v38 }
 0x35a   : > { %v932_v46 = vpop.xlane.xlu1 %931 }
 0x35b   : > { %v956_v48 = vsub.f32 %v3700_v61, %v932_v46 }
 0x35d   : > { %v983_v52 = vmul.f32 1.442695, %v956_v48 }
 0x35f   : > { %3202 = vpow2.f32 %v983_v52 }
 0x360   : > { %3204 = vpow2.f32 %v987_v49 }
 0x361   : > { %3206 = vpow2.f32 %v991_v18 }
 0x369   : > { %v3203_v55 = vpop.eup %3202 }
 0x36a   : > { %2894 = vmatmul.mubr.msk.f32.gmra.mrb[18].mxu1 %vm896_vm3, %v3203_v55  ;;  %v1026_v59 = vsel %vm896_vm3, %v3203_v55, 0.0  ;;  %v3205_v54 = vpop.eup %3204 }
 0x36b   : > { %1027 = vadd.xlane.f32.xlu1 %v1026_v59  ;;  %2896 = vmatprep.mubr.msk.f32.mxu1 %vm896_vm3, %v3199_v34  ;;  %v1032_v61 = vsel %vm896_vm3, %v3205_v54, 0.0  ;;  %v3207_v62 = vpop.eup %3206 }
 0x36c   : > { %v1038_v8 = vsel %vm896_vm3, %v3207_v62, 0.0 }
 0x36e   : > { %2897 = vmatmul.mubr.msk.f32.gmra.mrb[20].mxu1 %vm896_vm3, %v3205_v54 }
 0x36f   : > { %1033 = vadd.xlane.f32.xlu1 %v1032_v61  ;;  %2899 = vmatprep.mubr.msk.f32.mxu1 %vm896_vm3, %v3201_v36 }
 0x372   : > { %2900 = vmatmul.mubr.msk.f32.gmra.mrb[22].mxu1 %vm896_vm3, %v3207_v62 }
 0x373   : > { %1039 = vadd.xlane.f32.xlu1 %v1038_v8  ;;  %2944 = vmatprep.mubr.msk.f32.mxu1 %vm588_vm1, %v1539_v56 }
 0x376   : > { %2945 = vmatmul.mubr.msk.f32.vlgmr.msra.gmra.mrb[24].mxu1 %vm588_vm1, %v1540_v57 }
 0x377   : > { %2947 = vmatprep.mubr.msk.f32.mxu1 %vm588_vm1, %v1541_v58  ;;  %3009 = vmatpush3.msra.mxu1 %v3656_v22  ;;  %v1549_v22 = vld [vmem:[#allocation2 + $0xd0] sm:$0xff] }
 0x37a   : > { %2948 = vmatmul.mubr.msk.f32.gmra.mrb[26].mxu1 %vm588_vm1, %v1542_v41 }
 0x37b   : > { %2950 = vmatprep.mubr.msk.f32.mxu1 %vm588_vm1, %v1543_v63 }
 0x37e   : > { %2951 = vmatmul.mubr.msk.f32.gmra.mrb[28].mxu1 %vm588_vm1, %v1544_v43 }
 0x37f   : > { %2953 = vmatprep.mubr.msk.f32.mxu1 %vm588_vm1, %v1545_v3 }
 0x382   : > { %2954 = vmatmul.mubr.msk.f32.gmra.mrb[30].mxu1 %vm588_vm1, %v1546_v2 }
 0x383   : > { %2956 = vmatprep.mubr.msk.f32.mxu1 %vm588_vm1, %v1547_v35 }
 0x386   : > { %2957 = vmatmul.mubr.msk.f32.gmra.mrb[32].mxu1 %vm588_vm1, %v1548_v50 }
 0x387   : > { %2959 = vmatprep.mubr.msk.f32.mxu1 %vm588_vm1, %v1549_v22 }
 0x38a   : > { %2960 = vmatmul.mubr.msk.f32.gmra.mrb[34].mxu1 %vm588_vm1, %v1550_v5 }
 0x38b   : > { %2962 = vmatprep.mubr.msk.f32.mxu1 %vm588_vm1, %v1551_v7 }
 0x38e   : > { %2963 = vmatmul.mubr.msk.f32.gmra.mrb[36].mxu1 %vm588_vm1, %v1552_v9 }
 0x38f   : > { %2965 = vmatprep.mubr.msk.f32.mxu1 %vm588_vm1, %v1553_v11 }
 0x392   : > { %2966 = vmatmul.mubr.msk.f32.gmra.mrb[38].mxu1 %vm588_vm1, %v1554_v12 }
 0x3b6   : > { %v998_v0 = vpop.xlane.xlu0 %997 }
 0x3ba   : > { %v995_v37 = vpop.xlane.xlu0 %994 }
 0x3bb   : > { %3208 = vrcp.f32 %v995_v37 }
 0x3bc   : > { %3210 = vrcp.f32 %v998_v0 }
 0x3c2   : > { %v1004_v39 = vpop.xlane.xlu0 %1003 }
 0x3c5   : > { %v3209_v16 = vpop.eup %3208 }
 0x3c6   : > { %v1001_v13 = vpop.xlane.xlu0 %1000  ;;  %v3211_v4 = vpop.eup %3210 }
 0x3c7   : > { %3212 = vrcp.f32 %v1001_v13 }
 0x3c8   : > { %3214 = vrcp.f32 %v1004_v39 }
 0x3ca   : > { %v1010_v60 = vpop.xlane.xlu1 %1009 }
 0x3ce   : > { %v1007_v6 = vpop.xlane.xlu0 %1006 }
 0x3cf   : > { %3216 = vrcp.f32 %v1007_v6 }
 0x3d0   : > { %3218 = vrcp.f32 %v1010_v60 }
 0x3d1   : > { %v3213_v24 = vpop.eup %3212 }
 0x3d2   : > { %v1013_v20 = vpop.xlane.xlu0 %1012  ;;  %v1016_v21 = vpop.xlane.xlu1 %1015 }
 0x3d3   : > { %v3215_v26 = vpop.eup %3214  ;;  %3220 = vrcp.f32 %v1013_v20 }
 0x3d4   : > { %3222 = vrcp.f32 %v1016_v21 }
 0x3d6   : > { %v1019_v28 = vpop.xlane.xlu0 %1018 }
 0x3d7   : > { %3224 = vrcp.f32 %v1019_v28 }
 0x3d9   : > { %v3217_v30 = vpop.eup %3216 }
 0x3da   : > { %v1025_v52 = vpop.xlane.xlu0 %1024 }
 0x3de   : > { %v1031_v55 = vpop.xlane.xlu0 %1030 }
 0x3e2   : > { %v1037_v54 = vpop.xlane.xlu0 %1036 }
 0x405   : > { %v2880_v15 = vpop.f32.mrb[8].mxu1 }
 0x406   : > { %v1179_v17 = vpop.f32.mrb[9].mxu1  ;;  %v1275_v19 = vmul.f32 %v3211_v4, %v2880_v15 }
 0x407   : > { %v1274_v45 = vmul.f32 %v3209_v16, %v1179_v17 }
 0x409   : > { %2904 = vmatprep.mubr.msk.f32.mxu0 %vm1296_vm4, %v1274_v45 }
 0x40a   : > { %2905 = vmatmul.mubr.msk.f32.vlgmr.msra.gmra.mrb[40].mxu0 %vm1296_vm4, %v1275_v19 }
 0x40b   : > { %3105 = vmatpush3.bf16.msra.mxu0 %v3658_v23  ;;  %v1022_v23 = vpop.xlane.xlu1 %1021 }
 0x40c   : > { %3107 = vmatprep.subr.bf16.mxu0 %v3670_v32  ;;  %v2883_v1 = vpop.f32.mrb[10].mxu1  ;;  %3226 = vrcp.f32 %v1022_v23 }
 0x40d   : > { %v1189_v25 = vpop.f32.mrb[11].mxu1  ;;  %v1277_v27 = vmul.f32 %v3215_v26, %v2883_v1  ;;  %3228 = vrcp.f32 %v1025_v52 }
 0x40e   : > { %v1276_v10 = vmul.f32 %v3213_v24, %v1189_v25 }
 0x40f   : > { %3109 = vmatpush3.bf16.msra.mxu0 %v3670_v32  ;;  %v3219_v32 = vpop.eup %3218  ;;  %v1028_v18 = vpop.xlane.xlu1 %1027 }
 0x410   : > { %3111 = vmatprep.subr.bf16.mxu0 %v3680_v44  ;;  %2907 = vmatprep.mubr.msk.f32.mxu0 %vm1296_vm4, %v1276_v10  ;;  %v3221_v14 = vpop.eup %3220  ;;  %3230 = vrcp.f32 %v1028_v18 }
 0x411   : > { %2908 = vmatmul.mubr.msk.f32.gmra.mrb[42].mxu0 %vm1296_vm4, %v1277_v27  ;;  %3232 = vrcp.f32 %v1031_v55  ;;  %v1491_v55 = vld [vmem:[%s3366_s27 + $0x8] sm:$0xff] }
 0x413   : > { %3113 = vmatpush3.bf16.msra.mxu0 %v3680_v44  ;;  %v3223_v44 = vpop.eup %3222  ;;  %v1034_v59 = vpop.xlane.xlu1 %1033 }
 0x414   : > { %3115 = vmatprep.subr.bf16.mxu0 %v3752_v53  ;;  %v2886_v29 = vpop.f32.mrb[12].mxu1  ;;  %v3225_v46 = vpop.eup %3224  ;;  %3234 = vrcp.f32 %v1034_v59 }
 0x415   : > { %v1199_v31 = vpop.f32.mrb[13].mxu1  ;;  %v1279_v47 = vmul.f32 %v3219_v32, %v2886_v29  ;;  %3236 = vrcp.f32 %v1037_v54 }
 0x416   : > { %v1278_v33 = vmul.f32 %v3217_v30, %v1199_v31  ;;  %v3227_v49 = vpop.eup %3226 }
 0x417   : > { %3117 = vmatpush3.bf16.msra.mxu0 %v3752_v53  ;;  %v1040_v61 = vpop.xlane.xlu1 %1039  ;;  %v3229_v8 = vpop.eup %3228 }
 0x418   : > { %2910 = vmatprep.mubr.msk.f32.mxu0 %vm1296_vm4, %v1278_v33  ;;  %3238 = vrcp.f32 %v1040_v61 }
 0x419   : > { %v2889_v34 = vpop.f32.mrb[14].mxu1  ;;  %2911 = vmatmul.mubr.msk.f32.gmra.mrb[44].mxu0 %vm1296_vm4, %v1279_v47 }
 0x41a   : > { %v1209_v36 = vpop.f32.mrb[15].mxu1  ;;  %v1281_v40 = vmul.f32 %v3223_v44, %v2889_v34  ;;  %v3231_v57 = vpop.eup %3230 }
 0x41b   : > { %v1280_v38 = vmul.f32 %v3221_v14, %v1209_v36  ;;  %v3233_v43 = vpop.eup %3232 }
 0x41d   : > { %v2892_v42 = vpop.f32.mrb[16].mxu1  ;;  %2913 = vmatprep.mubr.msk.f32.mxu0 %vm1296_vm4, %v1280_v38 }
 0x41e   : > { %v1219_v48 = vpop.f32.mrb[17].mxu1  ;;  %2914 = vmatmul.mubr.msk.f32.gmra.mrb[46].mxu0 %vm1296_vm4, %v1281_v40  ;;  %v1283_v53 = vmul.f32 %v3227_v49, %v2892_v42  ;;  %v3235_v2 = vpop.eup %3234  ;;  %v3922_v49 = vld [vmem:[%s4127_s4] ss:$0 sm:$0xff] }
 0x41f   : > { %v1282_v51 = vmul.f32 %v3225_v46, %v1219_v48  ;;  %v3237_v5 = vpop.eup %3236 }
 0x421   : > { %2916 = vmatprep.mubr.msk.f32.mxu0 %vm1296_vm4, %v1282_v51 }
 0x422   : > { %2917 = vmatmul.mubr.msk.f32.gmra.mrb[48].mxu0 %vm1296_vm4, %v1283_v53  ;;  %v3239_v9 = vpop.eup %3238 }
 0x43d   : > { %v2895_v62 = vpop.f32.mrb[18].mxu1 }
 0x43e   : > { %v1229_v56 = vpop.f32.mrb[19].mxu1  ;;  %v1285_v41 = vmul.f32 %v3231_v57, %v2895_v62 }
 0x43f   : > { %v1284_v58 = vmul.f32 %v3229_v8, %v1229_v56  ;;  %v1490_v8 = vld [vmem:[%s3366_s27] sm:$0xff] }
 0x441   : > { %v2898_v63 = vpop.f32.mrb[20].mxu1  ;;  %2919 = vmatprep.mubr.msk.f32.mxu0 %vm1296_vm4, %v1284_v58 }
 0x442   : > { %v1239_v3 = vpop.f32.mrb[21].mxu1  ;;  %2920 = vmatmul.mubr.msk.f32.gmra.mrb[50].mxu0 %vm1296_vm4, %v1285_v41  ;;  %v1287_v50 = vmul.f32 %v3235_v2, %v2898_v63 }
 0x443   : > { %v1286_v35 = vmul.f32 %v3233_v43, %v1239_v3 }
 0x445   : > { %v2901_v22 = vpop.f32.mrb[22].mxu1  ;;  %2922 = vmatprep.mubr.msk.f32.mxu0 %vm1296_vm4, %v1286_v35 }
 0x446   : > { %v1249_v7 = vpop.f32.mrb[23].mxu1  ;;  %2923 = vmatmul.mubr.msk.f32.gmra.mrb[52].mxu0 %vm1296_vm4, %v1287_v50  ;;  %v1289_v12 = vmul.f32 %v3239_v9, %v2901_v22 }
 0x447   : > { %v1288_v11 = vmul.f32 %v3237_v5, %v1249_v7  ;;  %v1493_v7 = vld [vmem:[%s3366_s27 + $0x18] sm:$0xff] }
 0x449   : > { %2925 = vmatprep.mubr.msk.f32.mxu0 %vm1296_vm4, %v1288_v11  ;;  %v2946_v0 = vpop.f32.mrb[24].mxu1 }
 0x44a   : > { %2926 = vmatmul.mubr.msk.f32.gmra.mrb[54].mxu0 %vm1296_vm4, %v1289_v12  ;;  %v1669_v37 = vpop.f32.mrb[25].mxu1  ;;  %v1751_v39 = vsel %vm896_vm3, %v2946_v0, -inf }
 0x44b   : > { %1752 = vmax.xlane.f32.xlu1 %v1751_v39  ;;  %v1748_v13 = vsel %vm896_vm3, %v1669_v37, -inf }
 0x44c   : > { %1749 = vmax.xlane.f32.xlu0 %v1748_v13 }
 0x44d   : > { %v2949_v6 = vpop.f32.mrb[26].mxu1 }
 0x44e   : > { %v3866_v15 = vpop.f32.mrb[27].mxu1  ;;  %v1757_v16 = vsel %vm896_vm3, %v2949_v6, -inf }
 0x44f   : > { %1758 = vmax.xlane.f32.xlu1 %v1757_v16  ;;  %v1754_v17 = vsel %vm896_vm3, %v3866_v15, -inf }
 0x450   : > { %1755 = vmax.xlane.f32.xlu0 %v1754_v17 }
 0x451   : > { %v3871_v4 = vpop.f32.mrb[28].mxu1 }
 0x452   : > { %v3873_v45 = vpop.f32.mrb[29].mxu1  ;;  %v1763_v60 = vsel %vm896_vm3, %v3871_v4, -inf }
 0x453   : > { %1764 = vmax.xlane.f32.xlu1 %v1763_v60  ;;  %v1760_v19 = vsel %vm896_vm3, %v3873_v45, -inf }
 0x454   : > { %1761 = vmax.xlane.f32.xlu0 %v1760_v19 }
 0x455   : > { %v3879_v20 = vpop.f32.mrb[30].mxu1 }
 0x456   : > { %v3881_v21 = vpop.f32.mrb[31].mxu1  ;;  %v1769_v1 = vsel %vm896_vm3, %v3879_v20, -inf }
 0x457   : > { %1770 = vmax.xlane.f32.xlu1 %v1769_v1  ;;  %v1766_v24 = vsel %vm896_vm3, %v3881_v21, -inf }
 0x458   : > { %1767 = vmax.xlane.f32.xlu0 %v1766_v24 }
 0x459   : > { %v3887_v25 = vpop.f32.mrb[32].mxu1 }
 0x45a   : > { %v3889_v26 = vpop.f32.mrb[33].mxu1  ;;  %v1775_v10 = vsel %vm896_vm3, %v3887_v25, -inf }
 0x45b   : > { %1776 = vmax.xlane.f32.xlu1 %v1775_v10  ;;  %v1772_v27 = vsel %vm896_vm3, %v3889_v26, -inf }
 0x45c   : > { %1773 = vmax.xlane.f32.xlu0 %v1772_v27 }
 0x45d   : > { %v3895_v28 = vpop.f32.mrb[34].mxu1 }
 0x45e   : > { %v3897_v23 = vpop.f32.mrb[35].mxu1  ;;  %v1781_v29 = vsel %vm896_vm3, %v3895_v28, -inf }
 0x45f   : > { %1782 = vmax.xlane.f32.xlu1 %v1781_v29  ;;  %v1778_v30 = vsel %vm896_vm3, %v3897_v23, -inf }
 0x460   : > { %1779 = vmax.xlane.f32.xlu0 %v1778_v30 }
 0x461   : > { %v3903_v31 = vpop.f32.mrb[36].mxu1 }
 0x462   : > { %v3905_v32 = vpop.f32.mrb[37].mxu1  ;;  %v1787_v33 = vsel %vm896_vm3, %v3903_v31, -inf }
 0x463   : > { %1788 = vmax.xlane.f32.xlu1 %v1787_v33  ;;  %v1784_v47 = vsel %vm896_vm3, %v3905_v32, -inf }
 0x464   : > { %1785 = vmax.xlane.f32.xlu0 %v1784_v47  ;;  %v1495_v47 = vld [vmem:[%s3366_s27 + $0x28] sm:$0xff] }
 0x465   : > { %v3911_v34 = vpop.f32.mrb[38].mxu1 }
 0x466   : > { %v3913_v14 = vpop.f32.mrb[39].mxu1  ;;  %v1793_v36 = vsel %vm896_vm3, %v3911_v34, -inf }
 0x467   : > { %1794 = vmax.xlane.f32.xlu1 %v1793_v36  ;;  %v1790_v44 = vsel %vm896_vm3, %v3913_v14, -inf }
 0x468   : > { %1791 = vmax.xlane.f32.xlu0 %v1790_v44 }
 0x4d8   : > { %v1753_v38 = vpop.xlane.xlu1 %1752 }
 0x4d9   : > { %v1797_v40 = vsub.f32 %v2946_v0, %v1753_v38  ;;  %v1750_v42 = vpop.xlane.xlu0 %1749 }
 0x4da   : > { %v1796_v46 = vsub.f32 %v1669_v37, %v1750_v42  ;;  %v1492_v37 = vld [vmem:[%s3366_s27 + $0x10] sm:$0xff] }
 0x4db   : > { %v1814_v48 = vmul.f32 1.442695, %v1797_v40 }
 0x4dc   : > { %v1812_v51 = vmul.f32 1.442695, %v1796_v46  ;;  %v1759_v53 = vpop.xlane.xlu1 %1758  ;;  %v1494_v46 = vld [vmem:[%s3366_s27 + $0x20] sm:$0xff] }
 0x4dd   : > { %3240 = vpow2.f32 %v1814_v48  ;;  %v1799_v52 = vsub.f32 %v2949_v6, %v1759_v53  ;;  %v2906_v18 = vpop.f32.mrb[40].mxu0  ;;  %v1756_v59 = vpop.xlane.xlu0 %1755 }
 0x4de   : > { %3242 = vpow2.f32 %v1812_v51  ;;  %v1417_v54 = vadd.f32 %v2906_v18, %v3922_v49  ;;  %v1798_v61 = vsub.f32 %v3866_v15, %v1756_v59  ;;  %v1411_v62 = vpop.f32.mrb[41].mxu0 }
 0x4df   : > { %v1818_v56 = vmul.f32 1.442695, %v1799_v52  ;;  %v1412_v57 = vadd.f32 %v3922_v49, %v1411_v62 }
 0x4e0   : > { %v1507_v58 = vadd.f32 %v1491_v55, %v1417_v54  ;;  %v1816_v41 = vmul.f32 1.442695, %v1798_v61  ;;  %v1765_v63 = vpop.xlane.xlu1 %1764 }
 0x4e1   : > { %3244 = vpow2.f32 %v1818_v56  ;;  %v1506_v43 = vadd.f32 %v1490_v8, %v1412_v57  ;;  %v1801_v3 = vsub.f32 %v3871_v4, %v1765_v63  ;;  %v1762_v2 = vpop.xlane.xlu0 %1761  ;;  %v1497_v56 = vld [vmem:[%s3366_s27 + $0x38] sm:$0xff] }
 0x4e2   : > { %1523 = vst.msk [vmem:[%s3933_s13 + $0x8] sm:$0xff] %vm266_vm0, %v1507_v58  ;;  %3246 = vpow2.f32 %v1816_v41  ;;  %v1800_v35 = vsub.f32 %v3873_v45, %v1762_v2 }
 0x4e3   : > { %1522 = vst.msk [vmem:[%s3933_s13] sm:$0xff] %vm266_vm0, %v1506_v43  ;;  %v1822_v50 = vmul.f32 1.442695, %v1801_v3  ;;  %v1496_v43 = vld [vmem:[%s3366_s27 + $0x30] sm:$0xff] }
 0x4e4   : > { %v1820_v22 = vmul.f32 1.442695, %v1800_v35  ;;  %v2909_v5 = vpop.f32.mrb[42].mxu0  ;;  %v1771_v9 = vpop.xlane.xlu1 %1770 }
 0x4e5   : > { %3248 = vpow2.f32 %v1822_v50  ;;  %v1427_v11 = vadd.f32 %v2909_v5, %v3922_v49  ;;  %v1803_v12 = vsub.f32 %v3879_v20, %v1771_v9  ;;  %v1421_v0 = vpop.f32.mrb[43].mxu0  ;;  %v1768_v39 = vpop.xlane.xlu0 %1767 }
 0x4e6   : > { %3250 = vpow2.f32 %v1820_v22  ;;  %v1422_v13 = vadd.f32 %v3922_v49, %v1421_v0  ;;  %v1802_v6 = vsub.f32 %v3881_v21, %v1768_v39 }
 0x4e7   : > { %v3241_v15 = vpop.eup %3240  ;;  %v1509_v16 = vadd.f32 %v1493_v7, %v1427_v11  ;;  %v1826_v17 = vmul.f32 1.442695, %v1803_v12 }
 0x4e8   : > { %v3243_v4 = vpop.eup %3242  ;;  %v1508_v45 = vadd.f32 %v1492_v37, %v1422_v13  ;;  %v1824_v60 = vmul.f32 1.442695, %v1802_v6  ;;  %v1777_v19 = vpop.xlane.xlu1 %1776  ;;  %v1847_v1 = vsel %vm896_vm3, %v3241_v15, 0.0 }
 0x4e9   : > { %1525 = vst.msk [vmem:[%s3933_s13 + $0x18] sm:$0xff] %vm266_vm0, %v1509_v16  ;;  %3252 = vpow2.f32 %v1826_v17  ;;  %v1805_v20 = vsub.f32 %v3887_v25, %v1777_v19  ;;  %v1774_v24 = vpop.xlane.xlu0 %1773  ;;  %1848 = vadd.xlane.f32.xlu1 %v1847_v1  ;;  %2984 = vmatprep.mubr.msk.f32.mxu0 %vm896_vm3, %v3243_v4  ;;  %v1844_v21 = vsel %vm896_vm3, %v3243_v4, 0.0 }
 0x4ea   : > { %1524 = vst.msk [vmem:[%s3933_s13 + $0x10] sm:$0xff] %vm266_vm0, %v1508_v45  ;;  %3254 = vpow2.f32 %v1824_v60  ;;  %v1804_v10 = vsub.f32 %v3889_v26, %v1774_v24  ;;  %1845 = vadd.xlane.f32.xlu0 %v1844_v21  ;;  %2985 = vmatmul.mubr.msk.f32.vlgmr.msra.gmra.mrb[56].mxu0 %vm896_vm3, %v3241_v15  ;;  %v1498_v15 = vld [vmem:[%s3366_s27 + $0x40] sm:$0xff] }
 0x4eb   : > { %v3245_v27 = vpop.eup %3244  ;;  %v1830_v29 = vmul.f32 1.442695, %v1805_v20 }
 0x4ec   : > { %v3247_v30 = vpop.eup %3246  ;;  %v1828_v33 = vmul.f32 1.442695, %v1804_v10  ;;  %v2912_v25 = vpop.f32.mrb[44].mxu0  ;;  %v1853_v44 = vsel %vm896_vm3, %v3245_v27, 0.0 }
 0x4ed   : > { %v1783_v36 = vpop.xlane.xlu1 %1782  ;;  %3256 = vpow2.f32 %v1830_v29  ;;  %v1437_v38 = vadd.f32 %v2912_v25, %v3922_v49  ;;  %v1431_v42 = vpop.f32.mrb[45].mxu0  ;;  %1854 = vadd.xlane.f32.xlu1 %v1853_v44  ;;  %2987 = vmatprep.mubr.msk.f32.mxu0 %vm896_vm3, %v3247_v30  ;;  %v1850_v48 = vsel %vm896_vm3, %v3247_v30, 0.0 }
 0x4ee   : > { %v1807_v40 = vsub.f32 %v3895_v28, %v1783_v36  ;;  %v1780_v26 = vpop.xlane.xlu0 %1779  ;;  %3258 = vpow2.f32 %v1828_v33  ;;  %v1432_v51 = vadd.f32 %v3922_v49, %v1431_v42  ;;  %1851 = vadd.xlane.f32.xlu0 %v1850_v48  ;;  %2988 = vmatmul.mubr.msk.f32.gmra.mrb[58].mxu0 %vm896_vm3, %v3245_v27  ;;  %v1501_v42 = vld [vmem:[%s3366_s27 + $0x58] sm:$0xff]  ;;  %v1500_v48 = vld [vmem:[%s3366_s27 + $0x50] sm:$0xff] }
 0x4ef   : > { %v1806_v53 = vsub.f32 %v3897_v23, %v1780_v26  ;;  %v3249_v52 = vpop.eup %3248  ;;  %v1511_v28 = vadd.f32 %v1495_v47, %v1437_v38 }
 0x4f0   : > { %v1834_v18 = vmul.f32 1.442695, %v1807_v40  ;;  %v3251_v55 = vpop.eup %3250  ;;  %v1510_v59 = vadd.f32 %v1494_v46, %v1432_v51  ;;  %v1859_v62 = vsel %vm896_vm3, %v3249_v52, 0.0 }
 0x4f1   : > { %v1832_v54 = vmul.f32 1.442695, %v1806_v53  ;;  %v1789_v61 = vpop.xlane.xlu1 %1788  ;;  %1527 = vst.msk [vmem:[%s3933_s13 + $0x28] sm:$0xff] %vm266_vm0, %v1511_v28  ;;  %v2915_v8 = vpop.f32.mrb[46].mxu0  ;;  %1860 = vadd.xlane.f32.xlu1 %v1859_v62  ;;  %2990 = vmatprep.mubr.msk.f32.mxu0 %vm896_vm3, %v3251_v55  ;;  %v1856_v58 = vsel %vm896_vm3, %v3251_v55, 0.0 }
 0x4f2   : > { %3260 = vpow2.f32 %v1834_v18  ;;  %v1809_v23 = vsub.f32 %v3903_v31, %v1789_v61  ;;  %v1786_v57 = vpop.xlane.xlu0 %1785  ;;  %1526 = vst.msk [vmem:[%s3933_s13 + $0x20] sm:$0xff] %vm266_vm0, %v1510_v59  ;;  %v1447_v41 = vadd.f32 %v2915_v8, %v3922_v49  ;;  %v1441_v63 = vpop.f32.mrb[47].mxu0  ;;  %1857 = vadd.xlane.f32.xlu0 %v1856_v58  ;;  %2991 = vmatmul.mubr.msk.f32.gmra.mrb[60].mxu0 %vm896_vm3, %v3249_v52  ;;  %v1503_v18 = vld [vmem:[%s3366_s27 + $0x68] sm:$0xff] }
 0x4f3   : > { %3262 = vpow2.f32 %v1832_v54  ;;  %v1808_v3 = vsub.f32 %v3905_v32, %v1786_v57  ;;  %v3253_v31 = vpop.eup %3252  ;;  %v1442_v35 = vadd.f32 %v3922_v49, %v1441_v63  ;;  %v1499_v32 = vld [vmem:[%s3366_s27 + $0x48] sm:$0xff]  ;;  %v1502_v54 = vld [vmem:[%s3366_s27 + $0x60] sm:$0xff] }
 0x4f4   : > { %v1838_v2 = vmul.f32 1.442695, %v1809_v23  ;;  %v3255_v50 = vpop.eup %3254  ;;  %v1513_v22 = vadd.f32 %v1497_v56, %v1447_v41  ;;  %v1865_v9 = vsel %vm896_vm3, %v3253_v31, 0.0  ;;  %v1505_v23 = vld [vmem:[%s3366_s27 + $0x78] sm:$0xff]  ;;  %v1504_v41 = vld [vmem:[%s3366_s27 + $0x70] sm:$0xff] }
 0x4f5   : > { %v1836_v5 = vmul.f32 1.442695, %v1808_v3  ;;  %v1795_v7 = vpop.xlane.xlu1 %1794  ;;  %v1512_v11 = vadd.f32 %v1496_v43, %v1442_v35  ;;  %v2918_v12 = vpop.f32.mrb[48].mxu0  ;;  %1866 = vadd.xlane.f32.xlu1 %v1865_v9  ;;  %2993 = vmatprep.mubr.msk.f32.mxu0 %vm896_vm3, %v3255_v50  ;;  %v1862_v39 = vsel %vm896_vm3, %v3255_v50, 0.0 }
 0x4f6   : > { %3264 = vpow2.f32 %v1838_v2  ;;  %v1811_v0 = vsub.f32 %v3911_v34, %v1795_v7  ;;  %v1792_v37 = vpop.xlane.xlu0 %1791  ;;  %1529 = vst.msk [vmem:[%s3933_s13 + $0x38] sm:$0xff] %vm266_vm0, %v1513_v22  ;;  %v1457_v13 = vadd.f32 %v2918_v12, %v3922_v49  ;;  %v1451_v6 = vpop.f32.mrb[49].mxu0  ;;  %1863 = vadd.xlane.f32.xlu0 %v1862_v39  ;;  %2994 = vmatmul.mubr.msk.f32.gmra.mrb[62].mxu0 %vm896_vm3, %v3253_v31 }
 0x4f7   : > { %3266 = vpow2.f32 %v1836_v5  ;;  %v1810_v16 = vsub.f32 %v3913_v14, %v1792_v37  ;;  %v3257_v34 = vpop.eup %3256  ;;  %1528 = vst.msk [vmem:[%s3933_s13 + $0x30] sm:$0xff] %vm266_vm0, %v1512_v11  ;;  %v1452_v4 = vadd.f32 %v3922_v49, %v1451_v6 }
 0x4f8   : > { %v1842_v17 = vmul.f32 1.442695, %v1811_v0  ;;  %v3259_v45 = vpop.eup %3258  ;;  %v1515_v60 = vadd.f32 %v1499_v32, %v1457_v13  ;;  %v1871_v1 = vsel %vm896_vm3, %v3257_v34, 0.0 }
 0x4f9   : > { %v1840_v19 = vmul.f32 1.442695, %v1810_v16  ;;  %v1514_v20 = vadd.f32 %v1498_v15, %v1452_v4  ;;  %1872 = vadd.xlane.f32.xlu1 %v1871_v1  ;;  %2996 = vmatprep.mubr.msk.f32.mxu0 %vm896_vm3, %v3259_v45  ;;  %v1868_v14 = vsel %vm896_vm3, %v3259_v45, 0.0 }
 0x4fa   : > { %3268 = vpow2.f32 %v1842_v17  ;;  %1531 = vst.msk [vmem:[%s3933_s13 + $0x48] sm:$0xff] %vm266_vm0, %v1515_v60  ;;  %1869 = vadd.xlane.f32.xlu0 %v1868_v14  ;;  %2997 = vmatmul.mubr.msk.f32.gmra.mrb[64].mxu0 %vm896_vm3, %v3257_v34 }
 0x4fb   : > { %3270 = vpow2.f32 %v1840_v19  ;;  %1530 = vst.msk [vmem:[%s3933_s13 + $0x40] sm:$0xff] %vm266_vm0, %v1514_v20 }
 0x4fc   : > { %v3261_v24 = vpop.eup %3260 }
 0x4fd   : > { %v3263_v21 = vpop.eup %3262  ;;  %v1877_v10 = vsel %vm896_vm3, %v3261_v24, 0.0 }
 0x4fe   : > { %1878 = vadd.xlane.f32.xlu1 %v1877_v10  ;;  %2999 = vmatprep.mubr.msk.f32.mxu0 %vm896_vm3, %v3263_v21  ;;  %v1874_v27 = vsel %vm896_vm3, %v3263_v21, 0.0 }
 0x4ff   : > { %1875 = vadd.xlane.f32.xlu0 %v1874_v27  ;;  %3000 = vmatmul.mubr.msk.f32.gmra.mrb[66].mxu0 %vm896_vm3, %v3261_v24 }
 0x500   : > { %v3265_v29 = vpop.eup %3264 }
 0x501   : > { %v3267_v30 = vpop.eup %3266  ;;  %v1883_v33 = vsel %vm896_vm3, %v3265_v29, 0.0 }
 0x502   : > { %1884 = vadd.xlane.f32.xlu1 %v1883_v33  ;;  %3002 = vmatprep.mubr.msk.f32.mxu0 %vm896_vm3, %v3267_v30  ;;  %v1880_v25 = vsel %vm896_vm3, %v3267_v30, 0.0 }
 0x503   : > { %1881 = vadd.xlane.f32.xlu0 %v1880_v25  ;;  %3003 = vmatmul.mubr.msk.f32.gmra.mrb[68].mxu0 %vm896_vm3, %v3265_v29 }
 0x504   : > { %v3269_v47 = vpop.eup %3268 }
 0x505   : > { %v3271_v36 = vpop.eup %3270  ;;  %v1889_v44 = vsel %vm896_vm3, %v3269_v47, 0.0 }
 0x506   : > { %1890 = vadd.xlane.f32.xlu1 %v1889_v44  ;;  %3005 = vmatprep.mubr.msk.f32.mxu0 %vm896_vm3, %v3271_v36  ;;  %v1886_v38 = vsel %vm896_vm3, %v3271_v36, 0.0 }
 0x507   : > { %1887 = vadd.xlane.f32.xlu0 %v1886_v38  ;;  %3006 = vmatmul.mubr.msk.f32.gmra.mrb[70].mxu0 %vm896_vm3, %v3269_v47 }
 0x515   : > { %v2921_v40 = vpop.f32.mrb[50].mxu0 }
 0x516   : > { %v1467_v46 = vadd.f32 %v2921_v40, %v3922_v49  ;;  %v1461_v26 = vpop.f32.mrb[51].mxu0 }
 0x517   : > { %v1462_v51 = vadd.f32 %v3922_v49, %v1461_v26 }
 0x518   : > { %v1517_v53 = vadd.f32 %v1501_v42, %v1467_v46 }
 0x519   : > { %v1516_v52 = vadd.f32 %v1500_v48, %v1462_v51  ;;  %v2924_v28 = vpop.f32.mrb[52].mxu0 }
 0x51a   : > { %1533 = vst.msk [vmem:[%s3933_s13 + $0x58] sm:$0xff] %vm266_vm0, %v1517_v53  ;;  %v1477_v55 = vadd.f32 %v2924_v28, %v3922_v49  ;;  %v1471_v59 = vpop.f32.mrb[53].mxu0 }
 0x51b   : > { %1532 = vst.msk [vmem:[%s3933_s13 + $0x50] sm:$0xff] %vm266_vm0, %v1516_v52  ;;  %v1472_v61 = vadd.f32 %v3922_v49, %v1471_v59 }
 0x51c   : > { %v1519_v62 = vadd.f32 %v1503_v18, %v1477_v55 }
 0x51d   : > { %v1518_v8 = vadd.f32 %v1502_v54, %v1472_v61  ;;  %v2927_v56 = vpop.f32.mrb[54].mxu0 }
 0x51e   : > { %1535 = vst.msk [vmem:[%s3933_s13 + $0x68] sm:$0xff] %vm266_vm0, %v1519_v62  ;;  %v1487_v57 = vadd.f32 %v2927_v56, %v3922_v49  ;;  %v1481_v58 = vpop.f32.mrb[55].mxu0 }
 0x51f   : > { %1534 = vst.msk [vmem:[%s3933_s13 + $0x60] sm:$0xff] %vm266_vm0, %v1518_v8  ;;  %v1482_v63 = vadd.f32 %v3922_v49, %v1481_v58 }
 0x520   : > { %v1521_v43 = vadd.f32 %v1505_v23, %v1487_v57 }
 0x521   : > { %v1520_v3 = vadd.f32 %v1504_v41, %v1482_v63 }
 0x522   : > { %1537 = vst.msk [vmem:[%s3933_s13 + $0x78] sm:$0xff] %vm266_vm0, %v1521_v43 }
 0x523   : > { %1536 = vst.msk [vmem:[%s3933_s13 + $0x70] sm:$0xff] %vm266_vm0, %v1520_v3 }
 0x576   : > { %v1849_v2 = vpop.xlane.xlu1 %1848 }
 0x577   : > { %v1846_v31 = vpop.xlane.xlu0 %1845 }
 0x578   : > { %3272 = vrcp.f32 %v1846_v31 }
 0x579   : > { %3274 = vrcp.f32 %v1849_v2 }
 0x57a   : > { %v1855_v50 = vpop.xlane.xlu1 %1854 }
 0x57b   : > { %v1852_v35 = vpop.xlane.xlu0 %1851 }
 0x57c   : > { %3276 = vrcp.f32 %v1852_v35  ;;  %v2571_v35 = vld [vmem:[%s3366_s27 + $0x88] sm:$0xff] }
 0x57d   : > { %3278 = vrcp.f32 %v1855_v50 }
 0x57e   : > { %v1861_v5 = vpop.xlane.xlu1 %1860 }
 0x57f   : > { %v1858_v22 = vpop.xlane.xlu0 %1857 }
 0x580   : > { %3280 = vrcp.f32 %v1858_v22 }
 0x581   : > { %3282 = vrcp.f32 %v1861_v5  ;;  %v2570_v5 = vld [vmem:[%s3366_s27 + $0x80] sm:$0xff] }
 0x582   : > { %v1867_v9 = vpop.xlane.xlu1 %1866  ;;  %v3273_v0 = vpop.eup %3272 }
 0x583   : > { %v1864_v7 = vpop.xlane.xlu0 %1863  ;;  %v3275_v39 = vpop.eup %3274 }
 0x584   : > { %3284 = vrcp.f32 %v1864_v7 }
 0x585   : > { %3286 = vrcp.f32 %v1867_v9 }
 0x586   : > { %v1873_v12 = vpop.xlane.xlu1 %1872  ;;  %v3277_v34 = vpop.eup %3276 }
 0x587   : > { %v1870_v11 = vpop.xlane.xlu0 %1869  ;;  %v3279_v45 = vpop.eup %3278 }
 0x588   : > { %3288 = vrcp.f32 %v1870_v11 }
 0x589   : > { %3290 = vrcp.f32 %v1873_v12 }
 0x58a   : > { %v3281_v20 = vpop.eup %3280 }
 0x58b   : > { %v1879_v17 = vpop.xlane.xlu1 %1878  ;;  %v3283_v24 = vpop.eup %3282 }
 0x58c   : > { %v1876_v15 = vpop.xlane.xlu0 %1875 }
 0x58d   : > { %3292 = vrcp.f32 %v1876_v15 }
 0x58e   : > { %3294 = vrcp.f32 %v1879_v17  ;;  %v3285_v33 = vpop.eup %3284 }
 0x58f   : > { %v1885_v27 = vpop.xlane.xlu1 %1884  ;;  %v3287_v47 = vpop.eup %3286 }
 0x590   : > { %v1882_v21 = vpop.xlane.xlu0 %1881 }
 0x591   : > { %3296 = vrcp.f32 %v1882_v21 }
 0x592   : > { %3298 = vrcp.f32 %v1885_v27  ;;  %v3289_v42 = vpop.eup %3288 }
 0x593   : > { %v1891_v46 = vpop.xlane.xlu1 %1890  ;;  %v3291_v48 = vpop.eup %3290 }
 0x594   : > { %v1888_v38 = vpop.xlane.xlu0 %1887 }
 0x595   : > { %3300 = vrcp.f32 %v1888_v38 }
 0x596   : > { %3302 = vrcp.f32 %v1891_v46 }
 0x597   : > { %v3293_v28 = vpop.eup %3292 }
 0x598   : > { %v3295_v55 = vpop.eup %3294 }
 0x59b   : > { %v3297_v62 = vpop.eup %3296 }
 0x59c   : > { %v3299_v56 = vpop.eup %3298 }
 0x59f   : > { %v3301_v41 = vpop.eup %3300 }
 0x5a0   : > { %v3303_v43 = vpop.eup %3302 }
 0x5bd   : > { %v2986_v32 = vpop.f32.mrb[56].mxu0 }
 0x5be   : > { %v2006_v37 = vpop.f32.mrb[57].mxu0  ;;  %v2102_v6 = vmul.f32 %v3275_v39, %v2986_v32  ;;  %v2573_v32 = vld [vmem:[%s3366_s27 + $0x98] sm:$0xff]  ;;  %v2572_v39 = vld [vmem:[%s3366_s27 + $0x90] sm:$0xff] }
 0x5bf   : > { %v2101_v13 = vmul.f32 %v3273_v0, %v2006_v37 }
 0x5c1   : > { %v2989_v16 = vpop.f32.mrb[58].mxu0  ;;  %3010 = vmatprep.mubr.msk.f32.mxu1 %vm1296_vm4, %v2101_v13 }
 0x5c2   : > { %v2016_v4 = vpop.f32.mrb[59].mxu0  ;;  %3011 = vmatmul.mubr.msk.f32.vlgmr.msra.gmra.mrb[40].mxu1 %vm1296_vm4, %v2102_v6  ;;  %v2104_v19 = vmul.f32 %v3279_v45, %v2989_v16  ;;  %v2574_v45 = vld [vmem:[%s3366_s27 + $0xa0] sm:$0xff] }
 0x5c3   : > { %v2103_v60 = vmul.f32 %v3277_v34, %v2016_v4  ;;  %v2575_v34 = vld [vmem:[%s3366_s27 + $0xa8] sm:$0xff] }
 0x5c5   : > { %v2992_v1 = vpop.f32.mrb[60].mxu0  ;;  %3013 = vmatprep.mubr.msk.f32.mxu1 %vm1296_vm4, %v2103_v60 }
 0x5c6   : > { %v2026_v14 = vpop.f32.mrb[61].mxu0  ;;  %3014 = vmatmul.mubr.msk.f32.gmra.mrb[42].mxu1 %vm1296_vm4, %v2104_v19  ;;  %v2106_v29 = vmul.f32 %v3283_v24, %v2992_v1 }
 0x5c7   : > { %v2105_v10 = vmul.f32 %v3281_v20, %v2026_v14  ;;  %v2577_v14 = vld [vmem:[%s3366_s27 + $0xb8] sm:$0xff] }
 0x5c9   : > { %v2995_v30 = vpop.f32.mrb[62].mxu0  ;;  %3016 = vmatprep.mubr.msk.f32.mxu1 %vm1296_vm4, %v2105_v10  ;;  %v2576_v10 = vld [vmem:[%s3366_s27 + $0xb0] sm:$0xff] }
 0x5ca   : > { %v2036_v25 = vpop.f32.mrb[63].mxu0  ;;  %3017 = vmatmul.mubr.msk.f32.gmra.mrb[44].mxu1 %vm1296_vm4, %v2106_v29  ;;  %v2108_v44 = vmul.f32 %v3287_v47, %v2995_v30 }
 0x5cb   : > { %v2107_v36 = vmul.f32 %v3285_v33, %v2036_v25  ;;  %v2579_v25 = vld [vmem:[%s3366_s27 + $0xc8] sm:$0xff] }
 0x5cd   : > { %v2998_v40 = vpop.f32.mrb[64].mxu0  ;;  %3019 = vmatprep.mubr.msk.f32.mxu1 %vm1296_vm4, %v2107_v36 }
 0x5ce   : > { %v2046_v26 = vpop.f32.mrb[65].mxu0  ;;  %3020 = vmatmul.mubr.msk.f32.gmra.mrb[46].mxu1 %vm1296_vm4, %v2108_v44  ;;  %v2110_v53 = vmul.f32 %v3291_v48, %v2998_v40  ;;  %v2578_v44 = vld [vmem:[%s3366_s27 + $0xc0] sm:$0xff] }
 0x5cf   : > { %v2109_v51 = vmul.f32 %v3289_v42, %v2046_v26  ;;  %v2581_v26 = vld [vmem:[%s3366_s27 + $0xd8] sm:$0xff] }
 0x5d1   : > { %3022 = vmatprep.mubr.msk.f32.mxu1 %vm1296_vm4, %v2109_v51 }
 0x5d2   : > { %v3001_v52 = vpop.f32.mrb[66].mxu0  ;;  %3023 = vmatmul.mubr.msk.f32.gmra.mrb[48].mxu1 %vm1296_vm4, %v2110_v53  ;;  %v2580_v53 = vld [vmem:[%s3366_s27 + $0xd0] sm:$0xff] }
 0x5d3   : > { %v2056_v18 = vpop.f32.mrb[67].mxu0  ;;  %v2112_v54 = vmul.f32 %v3295_v55, %v3001_v52 }
 0x5d4   : > { %v2111_v59 = vmul.f32 %v3293_v28, %v2056_v18 }
 0x5d6   : > { %v3004_v61 = vpop.f32.mrb[68].mxu0  ;;  %3025 = vmatprep.mubr.msk.f32.mxu1 %vm1296_vm4, %v2111_v59  ;;  %v2583_v59 = vld [vmem:[%s3366_s27 + $0xe8] sm:$0xff] }
 0x5d7   : > { %v2066_v8 = vpop.f32.mrb[69].mxu0  ;;  %3026 = vmatmul.mubr.msk.f32.gmra.mrb[50].mxu1 %vm1296_vm4, %v2112_v54  ;;  %v2114_v57 = vmul.f32 %v3299_v56, %v3004_v61 }
 0x5d8   : > { %v2113_v23 = vmul.f32 %v3297_v62, %v2066_v8  ;;  %v2582_v62 = vld [vmem:[%s3366_s27 + $0xe0] sm:$0xff] }
 0x5da   : > { %v3007_v58 = vpop.f32.mrb[70].mxu0  ;;  %3028 = vmatprep.mubr.msk.f32.mxu1 %vm1296_vm4, %v2113_v23 }
 0x5db   : > { %v2076_v63 = vpop.f32.mrb[71].mxu0  ;;  %3029 = vmatmul.mubr.msk.f32.gmra.mrb[52].mxu1 %vm1296_vm4, %v2114_v57  ;;  %v2116_v31 = vmul.f32 %v3303_v43, %v3007_v58  ;;  %v2585_v58 = vld [vmem:[%s3366_s27 + $0xf8] sm:$0xff]  ;;  %v2584_v43 = vld [vmem:[%s3366_s27 + $0xf0] sm:$0xff] }
 0x5dc   : > { %v2115_v3 = vmul.f32 %v3301_v41, %v2076_v63 }
 0x5de   : > { %3031 = vmatprep.mubr.msk.f32.mxu1 %vm1296_vm4, %v2115_v3 }
 0x5df   : > { %3032 = vmatmul.mubr.msk.f32.gmra.mrb[54].mxu1 %vm1296_vm4, %v2116_v31 }
 0x695   : > { %v3012_v2 = vpop.f32.mrb[40].mxu1 }
 0x696   : > { %v2237_v50 = vadd.f32 %v3012_v2, %v3922_v49  ;;  %v2231_v22 = vpop.f32.mrb[41].mxu1 }
 0x697   : > { %v2232_v7 = vadd.f32 %v3922_v49, %v2231_v22 }
 0x698   : > { %v2328_v9 = vadd.f32 %v2571_v35, %v2237_v50 }
 0x699   : > { %v2327_v11 = vadd.f32 %v2570_v5, %v2232_v7  ;;  %v3015_v12 = vpop.f32.mrb[42].mxu1 }
 0x69a   : > { %2587 = vst.msk [vmem:[%s3933_s13 + $0x88] sm:$0xff] %vm266_vm0, %v2328_v9  ;;  %v2247_v0 = vadd.f32 %v3015_v12, %v3922_v49  ;;  %v2241_v37 = vpop.f32.mrb[43].mxu1 }
 0x69b   : > { %2586 = vst.msk [vmem:[%s3933_s13 + $0x80] sm:$0xff] %vm266_vm0, %v2327_v11  ;;  %v2242_v13 = vadd.f32 %v3922_v49, %v2241_v37 }
 0x69c   : > { %v2330_v6 = vadd.f32 %v2573_v32, %v2247_v0 }
 0x69d   : > { %v2329_v15 = vadd.f32 %v2572_v39, %v2242_v13  ;;  %v3018_v16 = vpop.f32.mrb[44].mxu1 }
 0x69e   : > { %2589 = vst.msk [vmem:[%s3933_s13 + $0x98] sm:$0xff] %vm266_vm0, %v2330_v6  ;;  %v2257_v17 = vadd.f32 %v3018_v16, %v3922_v49  ;;  %v2251_v4 = vpop.f32.mrb[45].mxu1 }
 0x69f   : > { %2588 = vst.msk [vmem:[%s3933_s13 + $0x90] sm:$0xff] %vm266_vm0, %v2329_v15  ;;  %v2252_v60 = vadd.f32 %v3922_v49, %v2251_v4 }
 0x6a0   : > { %v2332_v19 = vadd.f32 %v2575_v34, %v2257_v17 }
 0x6a1   : > { %v2331_v1 = vadd.f32 %v2574_v45, %v2252_v60  ;;  %v3021_v20 = vpop.f32.mrb[46].mxu1 }
 0x6a2   : > { %2591 = vst.msk [vmem:[%s3933_s13 + $0xa8] sm:$0xff] %vm266_vm0, %v2332_v19  ;;  %v2267_v24 = vadd.f32 %v3021_v20, %v3922_v49  ;;  %v2261_v21 = vpop.f32.mrb[47].mxu1 }
 0x6a3   : > { %2590 = vst.msk [vmem:[%s3933_s13 + $0xa0] sm:$0xff] %vm266_vm0, %v2331_v1  ;;  %v2262_v27 = vadd.f32 %v3922_v49, %v2261_v21 }
 0x6a4   : > { %v2334_v29 = vadd.f32 %v2577_v14, %v2267_v24 }
 0x6a5   : > { %v2333_v30 = vadd.f32 %v2576_v10, %v2262_v27  ;;  %v3024_v33 = vpop.f32.mrb[48].mxu1 }
 0x6a6   : > { %2593 = vst.msk [vmem:[%s3933_s13 + $0xb8] sm:$0xff] %vm266_vm0, %v2334_v29  ;;  %v2277_v47 = vadd.f32 %v3024_v33, %v3922_v49  ;;  %v2271_v36 = vpop.f32.mrb[49].mxu1 }
 0x6a7   : > { %2592 = vst.msk [vmem:[%s3933_s13 + $0xb0] sm:$0xff] %vm266_vm0, %v2333_v30  ;;  %v2272_v38 = vadd.f32 %v3922_v49, %v2271_v36 }
 0x6a8   : > { %v2336_v40 = vadd.f32 %v2579_v25, %v2277_v47 }
 0x6a9   : > { %v2335_v42 = vadd.f32 %v2578_v44, %v2272_v38 }
 0x6aa   : > { %v3027_v46 = vpop.f32.mrb[50].mxu1  ;;  %2595 = vst.msk [vmem:[%s3933_s13 + $0xc8] sm:$0xff] %vm266_vm0, %v2336_v40 }
 0x6ab   : > { %v2287_v48 = vadd.f32 %v3027_v46, %v3922_v49  ;;  %v2281_v51 = vpop.f32.mrb[51].mxu1  ;;  %2594 = vst.msk [vmem:[%s3933_s13 + $0xc0] sm:$0xff] %vm266_vm0, %v2335_v42 }
 0x6ac   : > { %v2282_v52 = vadd.f32 %v3922_v49, %v2281_v51 }
 0x6ad   : > { %v2338_v28 = vadd.f32 %v2581_v26, %v2287_v48 }
 0x6ae   : > { %v2337_v18 = vadd.f32 %v2580_v53, %v2282_v52  ;;  %v3030_v55 = vpop.f32.mrb[52].mxu1 }
 0x6af   : > { %2597 = vst.msk [vmem:[%s3933_s13 + $0xd8] sm:$0xff] %vm266_vm0, %v2338_v28  ;;  %v2297_v54 = vadd.f32 %v3030_v55, %v3922_v49  ;;  %v2291_v61 = vpop.f32.mrb[53].mxu1 }
 0x6b0   : > { %2596 = vst.msk [vmem:[%s3933_s13 + $0xd0] sm:$0xff] %vm266_vm0, %v2337_v18  ;;  %v2292_v8 = vadd.f32 %v3922_v49, %v2291_v61 }
 0x6b1   : > { %v2340_v56 = vadd.f32 %v2583_v59, %v2297_v54 }
 0x6b2   : > { %v2339_v23 = vadd.f32 %v2582_v62, %v2292_v8  ;;  %v3033_v57 = vpop.f32.mrb[54].mxu1 }
 0x6b3   : > { %2599 = vst.msk [vmem:[%s3933_s13 + $0xe8] sm:$0xff] %vm266_vm0, %v2340_v56  ;;  %v2307_v41 = vadd.f32 %v3033_v57, %v3922_v49  ;;  %v2301_v63 = vpop.f32.mrb[55].mxu1 }
 0x6b4   : > { %2598 = vst.msk [vmem:[%s3933_s13 + $0xe0] sm:$0xff] %vm266_vm0, %v2339_v23  ;;  %v2302_v3 = vadd.f32 %v3922_v49, %v2301_v63 }
 0x6b5   : > { %v2342_v31 = vadd.f32 %v2585_v58, %v2307_v41 }
 0x6b6   : > { %v2341_v2 = vadd.f32 %v2584_v43, %v2302_v3 }
 0x6b7   : > { %2601 = vst.msk [vmem:[%s3933_s13 + $0xf8] sm:$0xff] %vm266_vm0, %v2342_v31 }
 0x6b8   : > { %2600 = vst.msk [vmem:[%s3933_s13 + $0xf0] sm:$0xff] %vm266_vm0, %v2341_v2 }
 0x6b9 PF: > { %s15_s18 = sadd.s32 1, %s3310_s18  }
 0x6ba   : > { %p12_p4 = scmp.ge.s32.totalorder %s15_s18, 4  }
 0x6bc   :  { %14 = sbr.rel (!%p12_p4) target bundleno = 1 (0x1), region = 73 }

</bundles_post_ra>
